<compile_context>
chip_gen: v7x
topology: tpu7x:2x2x1
jax: 0.10.0
libtpu: 0.0.40
codegen_flags: <defaults>
</compile_context>

<pallas_src>
import functools

import jax
import jax.numpy as jnp
from jax.experimental import pallas as pl
from jax.experimental.pallas import tpu as pltpu


def _mlp_kernel(x_ref, w1_ref, b1_ref, w2_ref, b2_ref, y_ref, h_ref, z_ref,
                *, apply_relu):
    """One batch tile: z = x @ W1t + b1; h = relu?(z); y = h @ W2t + b2."""
    x = x_ref[...]                                                 # [TM, D_in]

    # linear1 — canonical [M,K] x [K,N] contraction (weights pre-transposed).
    z = jnp.dot(x, w1_ref[...], preferred_element_type=jnp.float32) + b1_ref[...]

    # relu is a trace-time constant: no SMEM flag, no full-tile select.
    h = jnp.maximum(z, 0.0) if apply_relu else z                   # [TM, H] f32

    # linear2 — cast h to the streamed weight dtype for the MXU (no-op for f32).
    y = jnp.dot(h.astype(w2_ref.dtype), w2_ref[...],
                preferred_element_type=jnp.float32) + b2_ref[...]  # [TM, D_out]

    y_ref[...] = y.astype(y_ref.dtype)
    h_ref[...] = h.astype(h_ref.dtype)
    z_ref[...] = z.astype(z_ref.dtype)


def _round_up(v, m):
    return ((v + m - 1) // m) * m


def _pick_block_rows(n, requested=None, max_rows=2048):
    """Largest 8-aligned batch tile; >=2 grid steps when n >= 16 so both v7x
    TensorCores get work under dimension_semantics=("parallel",)."""
    tm = n if requested is None else min(requested, n)
    tm = min(tm, max_rows)
    if n >= 16:
        tm = min(tm, pl.cdiv(n, 2))      # guarantee at least 2 parallel steps
    if tm < n:
        tm = max(8, (tm // 8) * 8)       # sublane-aligned partial blocks
    return tm


def _vmem_limit_bytes(tm, d_in, h, d_out, stream_bytes):
    """Scoped-VMEM request derived from actual padded, double-buffered buffers."""
    def tile(rows, cols, itemsize):
        return _round_up(rows, 8) * _round_up(cols, 128) * itemsize

    streamed = 2 * (tile(tm, d_in, stream_bytes)      # x      (2 pipeline bufs)
                    + tile(tm, d_out, 4)              # y
                    + tile(tm, h, 4)                  # h
                    + tile(tm, h, 4))                 # z
    resident = 2 * (tile(d_in, h, stream_bytes)       # w1t
                    + tile(h, d_out, stream_bytes)    # w2t
                    + tile(1, h, 4)                   # b1
                    + tile(1, d_out, 4))              # b2
    budget = streamed + resident + (4 << 20)          # headroom for internal scratch
    # Clamp: never below 8 MiB, never above 48 MiB (safe inside v7x's 64 MiB VMEM).
    return int(min(max(budget, 8 << 20), 48 << 20))


def model_forward(x, w1, b1, w2, b2, nb_relu_dim=-1, block_rows=None,
                  compute_dtype=jnp.float32):
    """Mirrors Model.forward. Returns (linear2(h), h, z).

    x  : [N, D_in]
    w1 : [H, D_in]   (PyTorch Linear weight layout)
    b1 : [H]
    w2 : [D_out, H]
    b2 : [D_out]
    """
    N, D_in = x.shape
    H = w1.shape[0]
    D_out = w2.shape[0]

    if nb_relu_dim == H or nb_relu_dim == -1:
        apply_relu = True
    elif nb_relu_dim == 0:
        apply_relu = False
    else:
        # TODO(synk): the PyTorch `else` branch calls torch.cat with two positional
        # tensors (invalid) and slices batch rows, not hidden dims; it raises at
        # runtime, so it is not reproduced here.
        raise NotImplementedError("partial-relu branch is invalid in the reference")

    # One-time wrapper transposes -> canonical [K, N] MXU contraction layout;
    # optional bf16 streaming of the large operands (f32 accumulation in-kernel).
    xs = x.astype(compute_dtype)
    w1t = w1.T.astype(compute_dtype)            # [D_in, H]
    w2t = w2.T.astype(compute_dtype)            # [H, D_out]
    b1r = b1.reshape(1, H).astype(jnp.float32)
    b2r = b2.reshape(1, D_out).astype(jnp.float32)

    TM = _pick_block_rows(N, block_rows)
    grid = (pl.cdiv(N, TM),)
    stream_bytes = jnp.dtype(compute_dtype).itemsize

    grid_spec = pl.GridSpec(
        grid=grid,
        in_specs=[
            pl.BlockSpec((TM, D_in), lambda i: (i, 0)),    # x: streamed per tile
            pl.BlockSpec((D_in, H), lambda i: (0, 0)),     # w1t: VMEM resident
            pl.BlockSpec((1, H), lambda i: (0, 0)),        # b1:  VMEM resident
            pl.BlockSpec((H, D_out), lambda i: (0, 0)),    # w2t: VMEM resident
            pl.BlockSpec((1, D_out), lambda i: (0, 0)),    # b2:  VMEM resident
        ],
        out_specs=(
            pl.BlockSpec((TM, D_out), lambda i: (i, 0)),   # y
            pl.BlockSpec((TM, H), lambda i: (i, 0)),       # h (written in-kernel)
            pl.BlockSpec((TM, H), lambda i: (i, 0)),       # z
        ),
    )

    kernel = functools.partial(_mlp_kernel, apply_relu=apply_relu)

    y, h, z = pl.pallas_call(
        kernel,
        out_shape=(
            jax.ShapeDtypeStruct((N, D_out), jnp.float32),  # linear2(h)
            jax.ShapeDtypeStruct((N, H), jnp.float32),      # h
            jax.ShapeDtypeStruct((N, H), jnp.float32),      # z
        ),
        grid_spec=grid_spec,
        compiler_params=pltpu.CompilerParams(
            dimension_semantics=("parallel",),              # megacore-splittable batch
            vmem_limit_bytes=_vmem_limit_bytes(TM, D_in, H, D_out, stream_bytes),
        ),
    )(xs, w1t, b1r, w2t, b2r)

    return y, h, z


def _reference(x, w1, b1, w2, b2, apply_relu):
    z = x @ w1.T + b1
    h = jnp.maximum(z, 0.0) if apply_relu else z
    y = h @ w2.T + b2
    return y, h, z


if __name__ == "__main__":
    # Shapes consistent with the module: X = randn(500, 2) fed to Model(2, 32, 2).
    N, D_in, H, D_out = 500, 2, 32, 2

    key = jax.random.PRNGKey(0)
    kx, k1, k2, k3, k4, ks = jax.random.split(key, 6)

    x = jax.random.normal(kx, (N, D_in), dtype=jnp.float32)
    bound1 = 1.0 / (D_in ** 0.5)
    bound2 = 1.0 / (H ** 0.5)
    w1 = jax.random.uniform(k1, (H, D_in), jnp.float32, -bound1, bound1)
    b1 = jax.random.uniform(k2, (H,), jnp.float32, -bound1, bound1)
    w2 = jax.random.uniform(k3, (D_out, H), jnp.float32, -bound2, bound2)
    b2 = jax.random.uniform(k4, (D_out,), jnp.float32, -bound2, bound2)

    # 1) relu path (nb_relu_dim=-1): N=500 -> >=2 parallel batch tiles (v7x megacore).
    y, h, z = model_forward(x, w1, b1, w2, b2, nb_relu_dim=-1)
    jax.block_until_ready((y, h, z))
    y_r, h_r, z_r = _reference(x, w1, b1, w2, b2, apply_relu=True)
    assert jnp.allclose(z, z_r, atol=1e-5), "z mismatch (relu path)"
    assert jnp.allclose(h, h_r, atol=1e-5), "h mismatch (relu path)"
    assert jnp.allclose(y, y_r, atol=1e-5), "y mismatch (relu path)"

    # 2) no-relu path (nb_relu_dim=0): separate trace-time specialization.
    y0, h0, z0 = model_forward(x, w1, b1, w2, b2, nb_relu_dim=0)
    jax.block_until_ready((y0, h0, z0))
    y0_r, h0_r, z0_r = _reference(x, w1, b1, w2, b2, apply_relu=False)
    assert jnp.allclose(z0, z0_r, atol=1e-5), "z mismatch (no-relu path)"
    assert jnp.allclose(h0, h0_r, atol=1e-5), "h mismatch (no-relu path)"
    assert jnp.allclose(y0, y0_r, atol=1e-5), "y mismatch (no-relu path)"

    # 3) Small batch (single grid step) to exercise the N < 16 path.
    xs_small = jax.random.normal(ks, (8, D_in), dtype=jnp.float32)
    ys, hs, zs = model_forward(xs_small, w1, b1, w2, b2, nb_relu_dim=-1)
    jax.block_until_ready((ys, hs, zs))
    ys_r, hs_r, zs_r = _reference(xs_small, w1, b1, w2, b2, apply_relu=True)
    assert jnp.allclose(zs, zs_r, atol=1e-5), "z mismatch (small batch)"
    assert jnp.allclose(hs, hs_r, atol=1e-5), "h mismatch (small batch)"
    assert jnp.allclose(ys, ys_r, atol=1e-5), "y mismatch (small batch)"

    # 4) bf16 streaming path (f32 accumulation), explicit small tile -> 4 grid steps.
    yb, hb, zb = model_forward(x, w1, b1, w2, b2, nb_relu_dim=-1,
                               block_rows=128, compute_dtype=jnp.bfloat16)
    jax.block_until_ready((yb, hb, zb))
    assert jnp.allclose(zb, z_r, atol=5e-2, rtol=5e-2), "z mismatch (bf16 path)"
    assert jnp.allclose(hb, h_r, atol=5e-2, rtol=5e-2), "h mismatch (bf16 path)"
    assert jnp.allclose(yb, y_r, atol=5e-2, rtol=5e-2), "y mismatch (bf16 path)"

    print("KERNEL_OK")
</pallas_src>

<mosaic_0001>
module attributes {stable_mosaic.version = 11 : i64} {
  func.func @_mlp_kernel(%arg0: i32, %arg1: memref<248x2xf32, #tpu.memory_space<vmem>>, %arg2: memref<2x32xf32, #tpu.memory_space<vmem>>, %arg3: memref<1x32xf32, #tpu.memory_space<vmem>>, %arg4: memref<32x2xf32, #tpu.memory_space<vmem>>, %arg5: memref<1x2xf32, #tpu.memory_space<vmem>>, %arg6: memref<248x2xf32, #tpu.memory_space<vmem>>, %arg7: memref<248x32xf32, #tpu.memory_space<vmem>>, %arg8: memref<248x32xf32, #tpu.memory_space<vmem>>) attributes {dimension_semantics = [#tpu.dimension_semantics<parallel>], iteration_bounds = array<i64: 3>, scalar_prefetch = 0 : i64, scratch_operands = 0 : i64, tpu.core_type = #tpu.core_type<tc>, window_params = [{transform_indices = @transform_0, window_bounds = array<i64: 248, 2>}, {pipeline_mode = #tpu.pipeline_mode<synchronous>, transform_indices = @transform_1, window_bounds = array<i64: 2, 32>}, {pipeline_mode = #tpu.pipeline_mode<synchronous>, transform_indices = @transform_2, window_bounds = array<i64: 1, 32>}, {pipeline_mode = #tpu.pipeline_mode<synchronous>, transform_indices = @transform_3, window_bounds = array<i64: 32, 2>}, {pipeline_mode = #tpu.pipeline_mode<synchronous>, transform_indices = @transform_4, window_bounds = array<i64: 1, 2>}, {transform_indices = @transform_5, window_bounds = array<i64: 248, 2>}, {transform_indices = @transform_6, window_bounds = array<i64: 248, 32>}, {transform_indices = @transform_7, window_bounds = array<i64: 248, 32>}]} {
    %c0 = arith.constant 0 : index
    %c0_0 = arith.constant 0 : index
    %0 = vector.load %arg1[%c0, %c0_0] : memref<248x2xf32, #tpu.memory_space<vmem>>, vector<248x2xf32>
    %c0_1 = arith.constant 0 : index
    %c0_2 = arith.constant 0 : index
    %1 = vector.load %arg2[%c0_1, %c0_2] : memref<2x32xf32, #tpu.memory_space<vmem>>, vector<2x32xf32>
    %cst = arith.constant dense<0.000000e+00> : vector<248x32xf32>
    %2 = tpu.matmul %0, %1, %cst {dimension_numbers = #tpu.dot_dimension_numbers<[1], [0], [0], [1], [0, 0, 1, 1], [], []>} : vector<248x2xf32>, vector<2x32xf32>, vector<248x32xf32> -> vector<248x32xf32>
    %c0_3 = arith.constant 0 : index
    %c0_4 = arith.constant 0 : index
    %3 = vector.load %arg3[%c0_3, %c0_4] : memref<1x32xf32, #tpu.memory_space<vmem>>, vector<1x32xf32>
    %4 = vector.broadcast %3 : vector<1x32xf32> to vector<248x32xf32>
    %5 = arith.addf %2, %4 : vector<248x32xf32>
    %cst_5 = arith.constant 0.000000e+00 : f32
    %6 = vector.broadcast %cst_5 : f32 to vector<248x32xf32>
    %7 = arith.maximumf %5, %6 : vector<248x32xf32>
    %c0_6 = arith.constant 0 : index
    %c0_7 = arith.constant 0 : index
    %8 = vector.load %arg4[%c0_6, %c0_7] : memref<32x2xf32, #tpu.memory_space<vmem>>, vector<32x2xf32>
    %cst_8 = arith.constant dense<0.000000e+00> : vector<248x2xf32>
    %9 = tpu.matmul %7, %8, %cst_8 {dimension_numbers = #tpu.dot_dimension_numbers<[1], [0], [0], [1], [0, 0, 1, 1], [], []>} : vector<248x32xf32>, vector<32x2xf32>, vector<248x2xf32> -> vector<248x2xf32>
    %c0_9 = arith.constant 0 : index
    %c0_10 = arith.constant 0 : index
    %10 = vector.load %arg5[%c0_9, %c0_10] : memref<1x2xf32, #tpu.memory_space<vmem>>, vector<1x2xf32>
    %11 = vector.broadcast %10 : vector<1x2xf32> to vector<248x2xf32>
    %12 = arith.addf %9, %11 : vector<248x2xf32>
    %c0_11 = arith.constant 0 : index
    %c0_12 = arith.constant 0 : index
    %13 = vector.load %arg6[%c0_11, %c0_12] : memref<248x2xf32, #tpu.memory_space<vmem>>, vector<248x2xf32>
    tpu.vector_store %arg6[%c0_11, %c0_12], %12 {strides = array<i32>} : memref<248x2xf32, #tpu.memory_space<vmem>>, vector<248x2xf32>,
    %c0_13 = arith.constant 0 : index
    %c0_14 = arith.constant 0 : index
    %14 = vector.load %arg7[%c0_13, %c0_14] : memref<248x32xf32, #tpu.memory_space<vmem>>, vector<248x32xf32>
    tpu.vector_store %arg7[%c0_13, %c0_14], %7 {strides = array<i32>} : memref<248x32xf32, #tpu.memory_space<vmem>>, vector<248x32xf32>,
    %c0_15 = arith.constant 0 : index
    %c0_16 = arith.constant 0 : index
    %15 = vector.load %arg8[%c0_15, %c0_16] : memref<248x32xf32, #tpu.memory_space<vmem>>, vector<248x32xf32>
    tpu.vector_store %arg8[%c0_15, %c0_16], %5 {strides = array<i32>} : memref<248x32xf32, #tpu.memory_space<vmem>>, vector<248x32xf32>,
    return
  }
  func.func @transform_0(%arg0: i32) -> (i32, i32) {
    %c0_i32 = arith.constant 0 : i32
    %c0_i32_0 = arith.constant 0 : i32
    return %arg0, %c0_i32 : i32, i32
  }
  func.func @transform_1(%arg0: i32) -> (i32, i32) {
    %c0_i32 = arith.constant 0 : i32
    %c0_i32_0 = arith.constant 0 : i32
    %c0_i32_1 = arith.constant 0 : i32
    return %c0_i32, %c0_i32_0 : i32, i32
  }
  func.func @transform_2(%arg0: i32) -> (i32, i32) {
    %c0_i32 = arith.constant 0 : i32
    %c0_i32_0 = arith.constant 0 : i32
    %c0_i32_1 = arith.constant 0 : i32
    return %c0_i32, %c0_i32_0 : i32, i32
  }
  func.func @transform_3(%arg0: i32) -> (i32, i32) {
    %c0_i32 = arith.constant 0 : i32
    %c0_i32_0 = arith.constant 0 : i32
    %c0_i32_1 = arith.constant 0 : i32
    return %c0_i32, %c0_i32_0 : i32, i32
  }
  func.func @transform_4(%arg0: i32) -> (i32, i32) {
    %c0_i32 = arith.constant 0 : i32
    %c0_i32_0 = arith.constant 0 : i32
    %c0_i32_1 = arith.constant 0 : i32
    return %c0_i32, %c0_i32_0 : i32, i32
  }
  func.func @transform_5(%arg0: i32) -> (i32, i32) {
    %c0_i32 = arith.constant 0 : i32
    %c0_i32_0 = arith.constant 0 : i32
    return %arg0, %c0_i32 : i32, i32
  }
  func.func @transform_6(%arg0: i32) -> (i32, i32) {
    %c0_i32 = arith.constant 0 : i32
    %c0_i32_0 = arith.constant 0 : i32
    return %arg0, %c0_i32 : i32, i32
  }
  func.func @transform_7(%arg0: i32) -> (i32, i32) {
    %c0_i32 = arith.constant 0 : i32
    %c0_i32_0 = arith.constant 0 : i32
    return %arg0, %c0_i32 : i32, i32
  }
}

</mosaic_0001>

<bundles_post_ra>
// kernel: tpu_custom_call.1
= control target key start
LH: loop header
LB: loop body
LE: loop exit
PB: predicated region body
PF: predicated region fallthrough
CT: control target
= control target key end

     0   :  { %s3871_s0 = inlined_call_operand.vmem [shape: f32[500,2], index: 0, kind: input, shape index: {}]   ;;  %s3872_s1 = inlined_call_operand.vmem [shape: f32[2,32], index: 1, kind: input, shape index: {}]   ;;  %s3873_s2 = inlined_call_operand.vmem [shape: f32[1,32], index: 2, kind: input, shape index: {}]   ;;  %s3874_s3 = inlined_call_operand.vmem [shape: f32[32,2], index: 3, kind: input, shape index: {}]   ;;  %s3875_s4 = inlined_call_operand.vmem [shape: f32[1,2], index: 4, kind: input, shape index: {}]   ;;  %s3876_s5 = inlined_call_operand.vmem [shape: f32[500,2], index: 5, kind: output, shape index: {0}]   ;;  %s3877_s6 = inlined_call_operand.vmem [shape: f32[500,32], index: 6, kind: output, shape index: {1}]   ;;  %s3878_s7 = inlined_call_operand.vmem [shape: f32[500,32], index: 7, kind: output, shape index: {2}]  }
   0x1   :  { %3879 = sst [smem:[#allocation5_spill]] %s3871_s0 }
   0x2   :  { %3880 = sst [smem:[#allocation6_spill]] %s3872_s1 }
   0x3   :  { %s2962_s24 = smov 0   ;;  %s2964_s25 = smov 0  }
   0x4   :  { %s2966_s26 = smov 0  }
   0x5 LB: > { %s2975_s27 = sadd.s32 4294967295, %s2821_s26   ;;  %s2977_s28 = sadd.s32 1, %s2821_s26   ;;  %s2821_s26 = sphi %s2966_s26, %s3901_s26   ;;  %s2817_s25 = sphi %s2964_s25, %s3900_s25   ;;  %s2813_s24 = sphi %s2962_s24, %s3899_s24  }
   0x6   : > { %s132_s29 = ssub.s32 %s2821_s26, %s2977_s28  ;;  %s135_s30 = sadd.s32 1, %s2817_s25 }
   0x7   : > { %p133_p0 = scmp.eq.s32.totalorder %s132_s29, 0  ;;  %p145_p1 = scmp.ne.s32.totalorder %s2817_s25, %s2813_s24 }
   0x8   : > { %p146_p2 = scmp.eq.s32.totalorder %s2975_s27, 2  ;;  %p2097_p3 = scmp.ge.s32.totalorder %s2821_s26, 1 }
   0x9   : > { %s2985_s8 = scalar_select %p133_p0, %s2817_s25, %s135_s30  }
   0xa   : > { %p2987_p4 = por %p146_p2, %p145_p1  ;;  %p251_p5 = scmp.lt.s32.totalorder %s2821_s26, 4 }
   0xc   : > { %p252_p6 = pnand %p2097_p3, %p251_p5 }
   0xd   : > { %s3882_s1 = sld [smem:[#allocation6_spill]] (!%p252_p6)  ;;  %vm456_vm0 = vcmask (!%p252_p6), 1041408   ;;  %s2995_s12 = smul.u32 (!%p252_p6), 31, %s2975_s27  ;;  %v2919_v1 = vmov (!%p252_p6), 0.0   ;;  %vm2920_vm1 = vmmov (!%p252_p6), 0   ;;  %v711_v2 = vld [vmem:[%s3874_s3] sm:$0xff] (!%p252_p6) }
   0xe   : > { %255 = sbr.rel (%p252_p6) target bundleno = 795 (0x31b), region = 40  ;;  %2266 = vmatprep.subr.mxu0 (!%p252_p6), %v2919_v1  ;;  %2268 = vmatprep.mubr.msk.f32.mxu0 (!%p252_p6), %vm2920_vm1, %v2919_v1  ;;  %v712_v3 = vld [vmem:[%s3874_s3 + $0x8] sm:$0xff] (!%p252_p6)  ;;  %v2921_v4 = vmov (!%p252_p6), 0.0|0.0   ;;  %vm362_vm2 = vcmask (!%p252_p6), 15360   ;;  %s3883_s0 = sld [smem:[#allocation5_spill]] (!%p252_p6)  ;;  %v713_v28 = vld [vmem:[%s3874_s3 + $0x10] sm:$0xff] (!%p252_p6) }
   0xf   : > { %p299_p7 = scmp.lt.s32.totalorder (!%p252_p6), %s2995_s12, 62  ;;  %2462 = vmatprep.subr.bf16.mxu1 (!%p252_p6), %v2921_v4  ;;  %v2463_v5 = vpack.c.bf16 (!%p252_p6), %v712_v3, %v711_v2  ;;  %2369 = vmatprep.mubr.msk.f32.mxu1 (!%p252_p6), %vm2920_vm1, %v2919_v1  ;;  %v714_v29 = vld [vmem:[%s3874_s3 + $0x18] sm:$0xff] (!%p252_p6)  ;;  %s279_s30 = sand.u32 (!%p252_p6), 1, %s2813_s24   ;;  %v3149_v40 = vld [vmem:[%s3873_s2] ss:$0 sm:$0xff] (!%p252_p6)  ;;  %vm722_vm3 = vcmask (!%p252_p6), 261120  }
  0x10   : > { %v2466_v30 = vpack.c.bf16 (!%p252_p6), %v714_v29, %v713_v28  ;;  %s3144_s10 = smul.u32 (!%p252_p6), 248, %s279_s30 }
  0x11   : > { %2464 = vmatpush3.bf16.msra.mxu1 (!%p252_p6), %v2463_v5 }
  0x12   : > { %2465 = vmatprep.subr.bf16.mxu1 (!%p252_p6), %v2921_v4  ;;  %s3153_s14 = scalar_lea.vmem (!%p252_p6), [#allocation4], %s3144_s10   ;;  %s3158_s24 = scalar_lea.vmem (!%p252_p6), [#allocation3], %s3144_s10  }
  0x13   : > { %v354_v0 = vld [vmem:[%s3882_s1] sm:$0x3] (!%p252_p6) }
  0x14   : > { %2267 = vmatpush3.msk.msra.mxu0 (!%p252_p6), %vm456_vm0, %v354_v0 }
  0x15   : > { %s300_s17 = scalar_select %p299_p7, %s2995_s12, 62  ;;  %2467 = vmatpush3.bf16.msra.mxu1 %v2466_v30 }
  0x16   : > { %s2196_s19 = smul.u32 (%p2987_p4), 248, %s2975_s27 }
  0x17   : > { %s2098_s18 = sshll.u32 %s300_s17, 3  ;;  %s3410_s17 = scalar_lea.vmem [#allocation2], %s3144_s10  }
  0x18   : > { %s3013_s21 = scalar_lea.vmem %s3883_s0, %s2098_s18  ;;  %s1145_s18 = ssub.s32 (%p2987_p4), 63, %s2995_s12 }
  0x19   : > { %v323_v6 = vld [vmem:[%s3013_s21] sm:$0xff]  ;;  %v324_v7 = vld [vmem:[%s3013_s21 + $0x8] sm:$0xff]  ;;  %v325_v8 = vld [vmem:[%s3013_s21 + $0x10] sm:$0xff]  ;;  %p1146_p8 = scmp.lt.s32.totalorder (%p2987_p4), %s1145_s18, 31  ;;  %s3511_s22 = scalar_lea.vmem (%p2987_p4), %s3876_s5, %s2196_s19  }
  0x1a   : > { %2269 = vmatmul.mubr.msk.f32.vlgmr.msra.gmra.mrb[0].mxu0 %vm362_vm2, %v323_v6  ;;  %v326_v9 = vld [vmem:[%s3013_s21 + $0x18] sm:$0xff]  ;;  %v327_v10 = vld [vmem:[%s3013_s21 + $0x20] sm:$0xff]  ;;  %v328_v11 = vld [vmem:[%s3013_s21 + $0x28] sm:$0xff] }
  0x1b   : > { %2271 = vmatprep.mubr.msk.f32.mxu0 %vm2920_vm1, %v2919_v1  ;;  %v329_v12 = vld [vmem:[%s3013_s21 + $0x30] sm:$0xff]  ;;  %v330_v13 = vld [vmem:[%s3013_s21 + $0x38] sm:$0xff]  ;;  %v331_v14 = vld [vmem:[%s3013_s21 + $0x40] sm:$0xff] }
  0x1c   : > { %v332_v15 = vld [vmem:[%s3013_s21 + $0x48] sm:$0xff]  ;;  %v333_v16 = vld [vmem:[%s3013_s21 + $0x50] sm:$0xff]  ;;  %v334_v17 = vld [vmem:[%s3013_s21 + $0x58] sm:$0xff] }
  0x1d   : > { %v335_v18 = vld [vmem:[%s3013_s21 + $0x60] sm:$0xff]  ;;  %v336_v19 = vld [vmem:[%s3013_s21 + $0x68] sm:$0xff]  ;;  %v337_v20 = vld [vmem:[%s3013_s21 + $0x70] sm:$0xff] }
  0x1e   : > { %2272 = vmatmul.mubr.msk.f32.gmra.mrb[2].mxu0 %vm362_vm2, %v324_v7  ;;  %v338_v21 = vld [vmem:[%s3013_s21 + $0x78] sm:$0xff]  ;;  %v339_v22 = vld [vmem:[%s3013_s21 + $0x80] sm:$0xff]  ;;  %v340_v23 = vld [vmem:[%s3013_s21 + $0x88] sm:$0xff] }
  0x1f   : > { %2274 = vmatprep.mubr.msk.f32.mxu0 %vm2920_vm1, %v2919_v1  ;;  %v341_v24 = vld [vmem:[%s3013_s21 + $0x90] sm:$0xff]  ;;  %v342_v25 = vld [vmem:[%s3013_s21 + $0x98] sm:$0xff]  ;;  %v343_v26 = vld [vmem:[%s3013_s21 + $0xa0] sm:$0xff] }
  0x20   : > { %v344_v27 = vld [vmem:[%s3013_s21 + $0xa8] sm:$0xff]  ;;  %v345_v31 = vld [vmem:[%s3013_s21 + $0xb0] sm:$0xff]  ;;  %v346_v32 = vld [vmem:[%s3013_s21 + $0xb8] sm:$0xff] }
  0x21   : > { %v347_v33 = vld [vmem:[%s3013_s21 + $0xc0] sm:$0xff]  ;;  %v348_v34 = vld [vmem:[%s3013_s21 + $0xc8] sm:$0xff]  ;;  %v349_v35 = vld [vmem:[%s3013_s21 + $0xd0] sm:$0xff] }
  0x22   : > { %2275 = vmatmul.mubr.msk.f32.gmra.mrb[4].mxu0 %vm362_vm2, %v325_v8  ;;  %v350_v36 = vld [vmem:[%s3013_s21 + $0xd8] sm:$0xff]  ;;  %v351_v37 = vld [vmem:[%s3013_s21 + $0xe0] sm:$0xff]  ;;  %v352_v38 = vld [vmem:[%s3013_s21 + $0xe8] sm:$0xff] }
  0x23   : > { %2277 = vmatprep.mubr.msk.f32.mxu0 %vm2920_vm1, %v2919_v1  ;;  %v353_v39 = vld [vmem:[%s3013_s21 + $0xf0] sm:$0xff] }
  0x26   : > { %2278 = vmatmul.mubr.msk.f32.gmra.mrb[6].mxu0 %vm362_vm2, %v326_v9 }
  0x27   : > { %2280 = vmatprep.mubr.msk.f32.mxu0 %vm2920_vm1, %v2919_v1 }
  0x2a   : > { %2281 = vmatmul.mubr.msk.f32.gmra.mrb[8].mxu0 %vm362_vm2, %v327_v10 }
  0x2b   : > { %2283 = vmatprep.mubr.msk.f32.mxu0 %vm2920_vm1, %v2919_v1 }
  0x2e   : > { %2284 = vmatmul.mubr.msk.f32.gmra.mrb[10].mxu0 %vm362_vm2, %v328_v11 }
  0x2f   : > { %2286 = vmatprep.mubr.msk.f32.mxu0 %vm2920_vm1, %v2919_v1 }
  0x32   : > { %2287 = vmatmul.mubr.msk.f32.gmra.mrb[12].mxu0 %vm362_vm2, %v329_v12 }
  0x33   : > { %2289 = vmatprep.mubr.msk.f32.mxu0 %vm2920_vm1, %v2919_v1 }
  0x36   : > { %2290 = vmatmul.mubr.msk.f32.gmra.mrb[14].mxu0 %vm362_vm2, %v330_v13 }
  0x37   : > { %2292 = vmatprep.mubr.msk.f32.mxu0 %vm2920_vm1, %v2919_v1 }
  0x3a   : > { %2293 = vmatmul.mubr.msk.f32.gmra.mrb[16].mxu0 %vm362_vm2, %v331_v14 }
  0x3b   : > { %2295 = vmatprep.mubr.msk.f32.mxu0 %vm2920_vm1, %v2919_v1 }
  0x3e   : > { %2296 = vmatmul.mubr.msk.f32.gmra.mrb[18].mxu0 %vm362_vm2, %v332_v15 }
  0x3f   : > { %2298 = vmatprep.mubr.msk.f32.mxu0 %vm2920_vm1, %v2919_v1 }
  0x42   : > { %2299 = vmatmul.mubr.msk.f32.gmra.mrb[20].mxu0 %vm362_vm2, %v333_v16 }
  0x43   : > { %2301 = vmatprep.mubr.msk.f32.mxu0 %vm2920_vm1, %v2919_v1 }
  0x46   : > { %2302 = vmatmul.mubr.msk.f32.gmra.mrb[22].mxu0 %vm362_vm2, %v334_v17 }
  0x47   : > { %2304 = vmatprep.mubr.msk.f32.mxu0 %vm2920_vm1, %v2919_v1 }
  0x4a   : > { %2305 = vmatmul.mubr.msk.f32.gmra.mrb[24].mxu0 %vm362_vm2, %v335_v18 }
  0x4b   : > { %2307 = vmatprep.mubr.msk.f32.mxu0 %vm2920_vm1, %v2919_v1 }
  0x4e   : > { %2308 = vmatmul.mubr.msk.f32.gmra.mrb[26].mxu0 %vm362_vm2, %v336_v19 }
  0x4f   : > { %2310 = vmatprep.mubr.msk.f32.mxu0 %vm2920_vm1, %v2919_v1 }
  0x52   : > { %2311 = vmatmul.mubr.msk.f32.gmra.mrb[28].mxu0 %vm362_vm2, %v337_v20 }
  0x53   : > { %2313 = vmatprep.mubr.msk.f32.mxu0 %vm2920_vm1, %v2919_v1 }
  0x56   : > { %2314 = vmatmul.mubr.msk.f32.gmra.mrb[30].mxu0 %vm362_vm2, %v338_v21 }
  0x57   : > { %2316 = vmatprep.mubr.msk.f32.mxu0 %vm2920_vm1, %v2919_v1 }
  0x5a   : > { %2317 = vmatmul.mubr.msk.f32.gmra.mrb[32].mxu0 %vm362_vm2, %v339_v22 }
  0x5b   : > { %2319 = vmatprep.mubr.msk.f32.mxu0 %vm2920_vm1, %v2919_v1 }
  0x5e   : > { %2320 = vmatmul.mubr.msk.f32.gmra.mrb[34].mxu0 %vm362_vm2, %v340_v23 }
  0x5f   : > { %2322 = vmatprep.mubr.msk.f32.mxu0 %vm2920_vm1, %v2919_v1 }
  0x62   : > { %2323 = vmatmul.mubr.msk.f32.gmra.mrb[36].mxu0 %vm362_vm2, %v341_v24 }
  0x63   : > { %2325 = vmatprep.mubr.msk.f32.mxu0 %vm2920_vm1, %v2919_v1 }
  0x66   : > { %2326 = vmatmul.mubr.msk.f32.gmra.mrb[38].mxu0 %vm362_vm2, %v342_v25 }
  0x67   : > { %2328 = vmatprep.mubr.msk.f32.mxu0 %vm2920_vm1, %v2919_v1 }
  0x6a   : > { %2329 = vmatmul.mubr.msk.f32.gmra.mrb[40].mxu0 %vm362_vm2, %v343_v26 }
  0x6b   : > { %2331 = vmatprep.mubr.msk.f32.mxu0 %vm2920_vm1, %v2919_v1 }
  0x6e   : > { %2332 = vmatmul.mubr.msk.f32.gmra.mrb[42].mxu0 %vm362_vm2, %v344_v27 }
  0x6f   : > { %2334 = vmatprep.mubr.msk.f32.mxu0 %vm2920_vm1, %v2919_v1 }
  0x72   : > { %2335 = vmatmul.mubr.msk.f32.gmra.mrb[44].mxu0 %vm362_vm2, %v345_v31 }
  0x73   : > { %2337 = vmatprep.mubr.msk.f32.mxu0 %vm2920_vm1, %v2919_v1 }
  0x76   : > { %2338 = vmatmul.mubr.msk.f32.gmra.mrb[46].mxu0 %vm362_vm2, %v346_v32 }
  0x77   : > { %2340 = vmatprep.mubr.msk.f32.mxu0 %vm2920_vm1, %v2919_v1 }
  0x7a   : > { %2341 = vmatmul.mubr.msk.f32.gmra.mrb[48].mxu0 %vm362_vm2, %v347_v33 }
  0x7b   : > { %2343 = vmatprep.mubr.msk.f32.mxu0 %vm2920_vm1, %v2919_v1 }
  0x7e   : > { %2344 = vmatmul.mubr.msk.f32.gmra.mrb[50].mxu0 %vm362_vm2, %v348_v34 }
  0x7f   : > { %2346 = vmatprep.mubr.msk.f32.mxu0 %vm2920_vm1, %v2919_v1 }
  0x82   : > { %2347 = vmatmul.mubr.msk.f32.gmra.mrb[52].mxu0 %vm362_vm2, %v349_v35 }
  0x83   : > { %2349 = vmatprep.mubr.msk.f32.mxu0 %vm2920_vm1, %v2919_v1 }
  0x86   : > { %2350 = vmatmul.mubr.msk.f32.gmra.mrb[54].mxu0 %vm362_vm2, %v350_v36 }
  0x87   : > { %2352 = vmatprep.mubr.msk.f32.mxu0 %vm2920_vm1, %v2919_v1 }
  0x8a   : > { %2353 = vmatmul.mubr.msk.f32.gmra.mrb[56].mxu0 %vm362_vm2, %v351_v37 }
  0x8b   : > { %2355 = vmatprep.mubr.msk.f32.mxu0 %vm2920_vm1, %v2919_v1 }
  0x8e   : > { %2356 = vmatmul.mubr.msk.f32.gmra.mrb[58].mxu0 %vm362_vm2, %v352_v38 }
  0x8f   : > { %2358 = vmatprep.mubr.msk.f32.mxu0 %vm2920_vm1, %v2919_v1 }
  0x92   : > { %2359 = vmatmul.mubr.msk.f32.gmra.mrb[60].mxu0 %vm362_vm2, %v353_v39 }
  0xed   : > { %v526_v41 = vpop.f32.mrb[0].mxu0 }
  0xee   : > { %v527_v42 = vadd.f32 %v3149_v40, %v526_v41  ;;  %v2270_v43 = vpop.f32.mrb[1].mxu0 }
  0xf0   : > { %v680_v44 = vmax.f32 %v527_v42, 0.0  ;;  %1098 = vst.msk [vmem:[%s3153_s14] sm:$0xff] %vm722_vm3, %v527_v42 }
  0xf1   : > { %v531_v45 = vpop.f32.mrb[2].mxu0 }
  0xf2   : > { %1067 = vst.msk [vmem:[%s3158_s24] sm:$0xff] %vm722_vm3, %v680_v44  ;;  %v532_v46 = vadd.f32 %v3149_v40, %v531_v45  ;;  %v2273_v47 = vpop.f32.mrb[3].mxu0  ;;  %2370 = vmatmul.mubr.msk.f32.vlgmr.msra.gmra.mrb[0].mxu1 %vm722_vm3, %v680_v44 }
  0xf3   : > { %2372 = vmatprep.mubr.msk.f32.mxu1 %vm2920_vm1, %v2919_v1 }
  0xf4   : > { %v681_v48 = vmax.f32 %v532_v46, 0.0  ;;  %1099 = vst.msk [vmem:[%s3153_s14 + $0x8] sm:$0xff] %vm722_vm3, %v532_v46 }
  0xf5   : > { %v536_v49 = vpop.f32.mrb[4].mxu0 }
  0xf6   : > { %1068 = vst.msk [vmem:[%s3158_s24 + $0x8] sm:$0xff] %vm722_vm3, %v681_v48  ;;  %v537_v50 = vadd.f32 %v3149_v40, %v536_v49  ;;  %v2276_v51 = vpop.f32.mrb[5].mxu0  ;;  %2373 = vmatmul.mubr.msk.f32.gmra.mrb[2].mxu1 %vm722_vm3, %v681_v48 }
  0xf7   : > { %2375 = vmatprep.mubr.msk.f32.mxu1 %vm2920_vm1, %v2919_v1 }
  0xf8   : > { %v682_v52 = vmax.f32 %v537_v50, 0.0  ;;  %1100 = vst.msk [vmem:[%s3153_s14 + $0x10] sm:$0xff] %vm722_vm3, %v537_v50 }
  0xf9   : > { %v541_v53 = vpop.f32.mrb[6].mxu0 }
  0xfa   : > { %1069 = vst.msk [vmem:[%s3158_s24 + $0x10] sm:$0xff] %vm722_vm3, %v682_v52  ;;  %v542_v54 = vadd.f32 %v3149_v40, %v541_v53  ;;  %v2279_v55 = vpop.f32.mrb[7].mxu0  ;;  %2376 = vmatmul.mubr.msk.f32.gmra.mrb[4].mxu1 %vm722_vm3, %v682_v52 }
  0xfb   : > { %2378 = vmatprep.mubr.msk.f32.mxu1 %vm2920_vm1, %v2919_v1 }
  0xfc   : > { %v683_v56 = vmax.f32 %v542_v54, 0.0  ;;  %1101 = vst.msk [vmem:[%s3153_s14 + $0x18] sm:$0xff] %vm722_vm3, %v542_v54 }
  0xfd   : > { %v546_v57 = vpop.f32.mrb[8].mxu0 }
  0xfe   : > { %1070 = vst.msk [vmem:[%s3158_s24 + $0x18] sm:$0xff] %vm722_vm3, %v683_v56  ;;  %v547_v58 = vadd.f32 %v3149_v40, %v546_v57  ;;  %v2282_v59 = vpop.f32.mrb[9].mxu0  ;;  %2379 = vmatmul.mubr.msk.f32.gmra.mrb[6].mxu1 %vm722_vm3, %v683_v56 }
  0xff   : > { %2381 = vmatprep.mubr.msk.f32.mxu1 %vm2920_vm1, %v2919_v1 }
 0x100   : > { %v684_v60 = vmax.f32 %v547_v58, 0.0  ;;  %1102 = vst.msk [vmem:[%s3153_s14 + $0x20] sm:$0xff] %vm722_vm3, %v547_v58 }
 0x101   : > { %v551_v61 = vpop.f32.mrb[10].mxu0 }
 0x102   : > { %1071 = vst.msk [vmem:[%s3158_s24 + $0x20] sm:$0xff] %vm722_vm3, %v684_v60  ;;  %v552_v62 = vadd.f32 %v3149_v40, %v551_v61  ;;  %v2285_v63 = vpop.f32.mrb[11].mxu0  ;;  %2382 = vmatmul.mubr.msk.f32.gmra.mrb[8].mxu1 %vm722_vm3, %v684_v60 }
 0x103   : > { %2384 = vmatprep.mubr.msk.f32.mxu1 %vm2920_vm1, %v2919_v1 }
 0x104   : > { %v685_v0 = vmax.f32 %v552_v62, 0.0  ;;  %1103 = vst.msk [vmem:[%s3153_s14 + $0x28] sm:$0xff] %vm722_vm3, %v552_v62 }
 0x105   : > { %v556_v2 = vpop.f32.mrb[12].mxu0 }
 0x106   : > { %1072 = vst.msk [vmem:[%s3158_s24 + $0x28] sm:$0xff] %vm722_vm3, %v685_v0  ;;  %v557_v3 = vadd.f32 %v3149_v40, %v556_v2  ;;  %v2288_v4 = vpop.f32.mrb[13].mxu0  ;;  %2385 = vmatmul.mubr.msk.f32.gmra.mrb[10].mxu1 %vm722_vm3, %v685_v0 }
 0x107   : > { %2387 = vmatprep.mubr.msk.f32.mxu1 %vm2920_vm1, %v2919_v1 }
 0x108   : > { %v686_v5 = vmax.f32 %v557_v3, 0.0  ;;  %1104 = vst.msk [vmem:[%s3153_s14 + $0x30] sm:$0xff] %vm722_vm3, %v557_v3 }
 0x109   : > { %v561_v6 = vpop.f32.mrb[14].mxu0 }
 0x10a   : > { %1073 = vst.msk [vmem:[%s3158_s24 + $0x30] sm:$0xff] %vm722_vm3, %v686_v5  ;;  %v562_v7 = vadd.f32 %v3149_v40, %v561_v6  ;;  %v2291_v8 = vpop.f32.mrb[15].mxu0  ;;  %2388 = vmatmul.mubr.msk.f32.gmra.mrb[12].mxu1 %vm722_vm3, %v686_v5 }
 0x10b   : > { %2390 = vmatprep.mubr.msk.f32.mxu1 %vm2920_vm1, %v2919_v1 }
 0x10c   : > { %v687_v9 = vmax.f32 %v562_v7, 0.0  ;;  %1105 = vst.msk [vmem:[%s3153_s14 + $0x38] sm:$0xff] %vm722_vm3, %v562_v7 }
 0x10d   : > { %v566_v10 = vpop.f32.mrb[16].mxu0 }
 0x10e   : > { %1074 = vst.msk [vmem:[%s3158_s24 + $0x38] sm:$0xff] %vm722_vm3, %v687_v9  ;;  %v567_v11 = vadd.f32 %v3149_v40, %v566_v10  ;;  %v2294_v12 = vpop.f32.mrb[17].mxu0  ;;  %2391 = vmatmul.mubr.msk.f32.gmra.mrb[14].mxu1 %vm722_vm3, %v687_v9 }
 0x10f   : > { %2393 = vmatprep.mubr.msk.f32.mxu1 %vm2920_vm1, %v2919_v1 }
 0x110   : > { %v688_v13 = vmax.f32 %v567_v11, 0.0  ;;  %1106 = vst.msk [vmem:[%s3153_s14 + $0x40] sm:$0xff] %vm722_vm3, %v567_v11 }
 0x111   : > { %v571_v14 = vpop.f32.mrb[18].mxu0 }
 0x112   : > { %1075 = vst.msk [vmem:[%s3158_s24 + $0x40] sm:$0xff] %vm722_vm3, %v688_v13  ;;  %v572_v15 = vadd.f32 %v3149_v40, %v571_v14  ;;  %v2297_v16 = vpop.f32.mrb[19].mxu0  ;;  %2394 = vmatmul.mubr.msk.f32.gmra.mrb[16].mxu1 %vm722_vm3, %v688_v13 }
 0x113   : > { %2396 = vmatprep.mubr.msk.f32.mxu1 %vm2920_vm1, %v2919_v1 }
 0x114   : > { %v689_v17 = vmax.f32 %v572_v15, 0.0  ;;  %1107 = vst.msk [vmem:[%s3153_s14 + $0x48] sm:$0xff] %vm722_vm3, %v572_v15 }
 0x115   : > { %v576_v18 = vpop.f32.mrb[20].mxu0 }
 0x116   : > { %1076 = vst.msk [vmem:[%s3158_s24 + $0x48] sm:$0xff] %vm722_vm3, %v689_v17  ;;  %v577_v19 = vadd.f32 %v3149_v40, %v576_v18  ;;  %v2300_v20 = vpop.f32.mrb[21].mxu0  ;;  %2397 = vmatmul.mubr.msk.f32.gmra.mrb[18].mxu1 %vm722_vm3, %v689_v17 }
 0x117   : > { %2399 = vmatprep.mubr.msk.f32.mxu1 %vm2920_vm1, %v2919_v1 }
 0x118   : > { %v690_v21 = vmax.f32 %v577_v19, 0.0  ;;  %1108 = vst.msk [vmem:[%s3153_s14 + $0x50] sm:$0xff] %vm722_vm3, %v577_v19 }
 0x119   : > { %v581_v22 = vpop.f32.mrb[22].mxu0 }
 0x11a   : > { %1077 = vst.msk [vmem:[%s3158_s24 + $0x50] sm:$0xff] %vm722_vm3, %v690_v21  ;;  %v582_v23 = vadd.f32 %v3149_v40, %v581_v22  ;;  %v2303_v24 = vpop.f32.mrb[23].mxu0  ;;  %2400 = vmatmul.mubr.msk.f32.gmra.mrb[20].mxu1 %vm722_vm3, %v690_v21 }
 0x11b   : > { %2402 = vmatprep.mubr.msk.f32.mxu1 %vm2920_vm1, %v2919_v1 }
 0x11c   : > { %v691_v25 = vmax.f32 %v582_v23, 0.0  ;;  %1109 = vst.msk [vmem:[%s3153_s14 + $0x58] sm:$0xff] %vm722_vm3, %v582_v23 }
 0x11d   : > { %v586_v26 = vpop.f32.mrb[24].mxu0 }
 0x11e   : > { %1078 = vst.msk [vmem:[%s3158_s24 + $0x58] sm:$0xff] %vm722_vm3, %v691_v25  ;;  %v587_v27 = vadd.f32 %v3149_v40, %v586_v26  ;;  %v2306_v28 = vpop.f32.mrb[25].mxu0  ;;  %2403 = vmatmul.mubr.msk.f32.gmra.mrb[22].mxu1 %vm722_vm3, %v691_v25 }
 0x11f   : > { %2405 = vmatprep.mubr.msk.f32.mxu1 %vm2920_vm1, %v2919_v1 }
 0x120   : > { %v692_v29 = vmax.f32 %v587_v27, 0.0  ;;  %1110 = vst.msk [vmem:[%s3153_s14 + $0x60] sm:$0xff] %vm722_vm3, %v587_v27 }
 0x121   : > { %v591_v30 = vpop.f32.mrb[26].mxu0 }
 0x122   : > { %1079 = vst.msk [vmem:[%s3158_s24 + $0x60] sm:$0xff] %vm722_vm3, %v692_v29  ;;  %v592_v31 = vadd.f32 %v3149_v40, %v591_v30  ;;  %v2309_v32 = vpop.f32.mrb[27].mxu0  ;;  %2406 = vmatmul.mubr.msk.f32.gmra.mrb[24].mxu1 %vm722_vm3, %v692_v29 }
 0x123   : > { %2408 = vmatprep.mubr.msk.f32.mxu1 %vm2920_vm1, %v2919_v1 }
 0x124   : > { %v693_v33 = vmax.f32 %v592_v31, 0.0  ;;  %1111 = vst.msk [vmem:[%s3153_s14 + $0x68] sm:$0xff] %vm722_vm3, %v592_v31 }
 0x125   : > { %v596_v34 = vpop.f32.mrb[28].mxu0 }
 0x126   : > { %1080 = vst.msk [vmem:[%s3158_s24 + $0x68] sm:$0xff] %vm722_vm3, %v693_v33  ;;  %v597_v35 = vadd.f32 %v3149_v40, %v596_v34  ;;  %v2312_v36 = vpop.f32.mrb[29].mxu0  ;;  %2409 = vmatmul.mubr.msk.f32.gmra.mrb[26].mxu1 %vm722_vm3, %v693_v33 }
 0x127   : > { %2411 = vmatprep.mubr.msk.f32.mxu1 %vm2920_vm1, %v2919_v1 }
 0x128   : > { %v694_v37 = vmax.f32 %v597_v35, 0.0  ;;  %1112 = vst.msk [vmem:[%s3153_s14 + $0x70] sm:$0xff] %vm722_vm3, %v597_v35 }
 0x129   : > { %v601_v38 = vpop.f32.mrb[30].mxu0 }
 0x12a   : > { %1081 = vst.msk [vmem:[%s3158_s24 + $0x70] sm:$0xff] %vm722_vm3, %v694_v37  ;;  %v602_v39 = vadd.f32 %v3149_v40, %v601_v38  ;;  %v2315_v41 = vpop.f32.mrb[31].mxu0  ;;  %2412 = vmatmul.mubr.msk.f32.gmra.mrb[28].mxu1 %vm722_vm3, %v694_v37 }
 0x12b   : > { %2414 = vmatprep.mubr.msk.f32.mxu1 %vm2920_vm1, %v2919_v1  ;;  %v3406_v41 = vld [vmem:[%s3875_s4] ss:$0 sm:$0xff] }
 0x12c   : > { %v695_v42 = vmax.f32 %v602_v39, 0.0  ;;  %1113 = vst.msk [vmem:[%s3153_s14 + $0x78] sm:$0xff] %vm722_vm3, %v602_v39 }
 0x12d   : > { %v606_v43 = vpop.f32.mrb[32].mxu0 }
 0x12e   : > { %1082 = vst.msk [vmem:[%s3158_s24 + $0x78] sm:$0xff] %vm722_vm3, %v695_v42  ;;  %v607_v44 = vadd.f32 %v3149_v40, %v606_v43  ;;  %v2318_v45 = vpop.f32.mrb[33].mxu0  ;;  %2415 = vmatmul.mubr.msk.f32.gmra.mrb[30].mxu1 %vm722_vm3, %v695_v42 }
 0x12f   : > { %2417 = vmatprep.mubr.msk.f32.mxu1 %vm2920_vm1, %v2919_v1 }
 0x130   : > { %v696_v46 = vmax.f32 %v607_v44, 0.0  ;;  %1114 = vst.msk [vmem:[%s3153_s14 + $0x80] sm:$0xff] %vm722_vm3, %v607_v44 }
 0x131   : > { %v611_v47 = vpop.f32.mrb[34].mxu0 }
 0x132   : > { %1083 = vst.msk [vmem:[%s3158_s24 + $0x80] sm:$0xff] %vm722_vm3, %v696_v46  ;;  %v612_v48 = vadd.f32 %v3149_v40, %v611_v47  ;;  %v2321_v49 = vpop.f32.mrb[35].mxu0  ;;  %2418 = vmatmul.mubr.msk.f32.gmra.mrb[32].mxu1 %vm722_vm3, %v696_v46 }
 0x133   : > { %2420 = vmatprep.mubr.msk.f32.mxu1 %vm2920_vm1, %v2919_v1 }
 0x134   : > { %v697_v50 = vmax.f32 %v612_v48, 0.0  ;;  %1115 = vst.msk [vmem:[%s3153_s14 + $0x88] sm:$0xff] %vm722_vm3, %v612_v48 }
 0x135   : > { %v616_v51 = vpop.f32.mrb[36].mxu0 }
 0x136   : > { %1084 = vst.msk [vmem:[%s3158_s24 + $0x88] sm:$0xff] %vm722_vm3, %v697_v50  ;;  %v617_v52 = vadd.f32 %v3149_v40, %v616_v51  ;;  %v2324_v53 = vpop.f32.mrb[37].mxu0  ;;  %2421 = vmatmul.mubr.msk.f32.gmra.mrb[34].mxu1 %vm722_vm3, %v697_v50 }
 0x137   : > { %2423 = vmatprep.mubr.msk.f32.mxu1 %vm2920_vm1, %v2919_v1 }
 0x138   : > { %v698_v54 = vmax.f32 %v617_v52, 0.0  ;;  %1116 = vst.msk [vmem:[%s3153_s14 + $0x90] sm:$0xff] %vm722_vm3, %v617_v52 }
 0x139   : > { %v621_v55 = vpop.f32.mrb[38].mxu0 }
 0x13a   : > { %1085 = vst.msk [vmem:[%s3158_s24 + $0x90] sm:$0xff] %vm722_vm3, %v698_v54  ;;  %v622_v56 = vadd.f32 %v3149_v40, %v621_v55  ;;  %v2327_v57 = vpop.f32.mrb[39].mxu0  ;;  %2424 = vmatmul.mubr.msk.f32.gmra.mrb[36].mxu1 %vm722_vm3, %v698_v54 }
 0x13b   : > { %2426 = vmatprep.mubr.msk.f32.mxu1 %vm2920_vm1, %v2919_v1 }
 0x13c   : > { %v699_v58 = vmax.f32 %v622_v56, 0.0  ;;  %1117 = vst.msk [vmem:[%s3153_s14 + $0x98] sm:$0xff] %vm722_vm3, %v622_v56 }
 0x13d   : > { %v626_v59 = vpop.f32.mrb[40].mxu0 }
 0x13e   : > { %1086 = vst.msk [vmem:[%s3158_s24 + $0x98] sm:$0xff] %vm722_vm3, %v699_v58  ;;  %v627_v60 = vadd.f32 %v3149_v40, %v626_v59  ;;  %v2330_v61 = vpop.f32.mrb[41].mxu0  ;;  %2427 = vmatmul.mubr.msk.f32.gmra.mrb[38].mxu1 %vm722_vm3, %v699_v58 }
 0x13f   : > { %2429 = vmatprep.mubr.msk.f32.mxu1 %vm2920_vm1, %v2919_v1 }
 0x140   : > { %v700_v62 = vmax.f32 %v627_v60, 0.0  ;;  %1118 = vst.msk [vmem:[%s3153_s14 + $0xa0] sm:$0xff] %vm722_vm3, %v627_v60 }
 0x141   : > { %v631_v63 = vpop.f32.mrb[42].mxu0 }
 0x142   : > { %1087 = vst.msk [vmem:[%s3158_s24 + $0xa0] sm:$0xff] %vm722_vm3, %v700_v62  ;;  %v632_v0 = vadd.f32 %v3149_v40, %v631_v63  ;;  %v2333_v2 = vpop.f32.mrb[43].mxu0  ;;  %2430 = vmatmul.mubr.msk.f32.gmra.mrb[40].mxu1 %vm722_vm3, %v700_v62 }
 0x143   : > { %2432 = vmatprep.mubr.msk.f32.mxu1 %vm2920_vm1, %v2919_v1 }
 0x144   : > { %v701_v3 = vmax.f32 %v632_v0, 0.0  ;;  %1119 = vst.msk [vmem:[%s3153_s14 + $0xa8] sm:$0xff] %vm722_vm3, %v632_v0 }
 0x145   : > { %v636_v4 = vpop.f32.mrb[44].mxu0 }
 0x146   : > { %1088 = vst.msk [vmem:[%s3158_s24 + $0xa8] sm:$0xff] %vm722_vm3, %v701_v3  ;;  %v637_v5 = vadd.f32 %v3149_v40, %v636_v4  ;;  %v2336_v6 = vpop.f32.mrb[45].mxu0  ;;  %2433 = vmatmul.mubr.msk.f32.gmra.mrb[42].mxu1 %vm722_vm3, %v701_v3 }
 0x147   : > { %2435 = vmatprep.mubr.msk.f32.mxu1 %vm2920_vm1, %v2919_v1 }
 0x148   : > { %v702_v7 = vmax.f32 %v637_v5, 0.0  ;;  %1120 = vst.msk [vmem:[%s3153_s14 + $0xb0] sm:$0xff] %vm722_vm3, %v637_v5 }
 0x149   : > { %v641_v8 = vpop.f32.mrb[46].mxu0 }
 0x14a   : > { %1089 = vst.msk [vmem:[%s3158_s24 + $0xb0] sm:$0xff] %vm722_vm3, %v702_v7  ;;  %v642_v9 = vadd.f32 %v3149_v40, %v641_v8  ;;  %v2339_v10 = vpop.f32.mrb[47].mxu0  ;;  %2436 = vmatmul.mubr.msk.f32.gmra.mrb[44].mxu1 %vm722_vm3, %v702_v7 }
 0x14b   : > { %2438 = vmatprep.mubr.msk.f32.mxu1 %vm2920_vm1, %v2919_v1 }
 0x14c   : > { %v703_v11 = vmax.f32 %v642_v9, 0.0  ;;  %1121 = vst.msk [vmem:[%s3153_s14 + $0xb8] sm:$0xff] %vm722_vm3, %v642_v9 }
 0x14d   : > { %v646_v12 = vpop.f32.mrb[48].mxu0 }
 0x14e   : > { %1090 = vst.msk [vmem:[%s3158_s24 + $0xb8] sm:$0xff] %vm722_vm3, %v703_v11  ;;  %v647_v13 = vadd.f32 %v3149_v40, %v646_v12  ;;  %v2342_v14 = vpop.f32.mrb[49].mxu0  ;;  %2439 = vmatmul.mubr.msk.f32.gmra.mrb[46].mxu1 %vm722_vm3, %v703_v11 }
 0x14f   : > { %2441 = vmatprep.mubr.msk.f32.mxu1 %vm2920_vm1, %v2919_v1 }
 0x150   : > { %v704_v15 = vmax.f32 %v647_v13, 0.0  ;;  %1122 = vst.msk [vmem:[%s3153_s14 + $0xc0] sm:$0xff] %vm722_vm3, %v647_v13 }
 0x151   : > { %v651_v16 = vpop.f32.mrb[50].mxu0 }
 0x152   : > { %1091 = vst.msk [vmem:[%s3158_s24 + $0xc0] sm:$0xff] %vm722_vm3, %v704_v15  ;;  %v652_v17 = vadd.f32 %v3149_v40, %v651_v16  ;;  %v2345_v18 = vpop.f32.mrb[51].mxu0  ;;  %2442 = vmatmul.mubr.msk.f32.gmra.mrb[48].mxu1 %vm722_vm3, %v704_v15 }
 0x153   : > { %2444 = vmatprep.mubr.msk.f32.mxu1 %vm2920_vm1, %v2919_v1 }
 0x154   : > { %v705_v19 = vmax.f32 %v652_v17, 0.0  ;;  %1123 = vst.msk [vmem:[%s3153_s14 + $0xc8] sm:$0xff] %vm722_vm3, %v652_v17 }
 0x155   : > { %v656_v20 = vpop.f32.mrb[52].mxu0 }
 0x156   : > { %1092 = vst.msk [vmem:[%s3158_s24 + $0xc8] sm:$0xff] %vm722_vm3, %v705_v19  ;;  %v657_v21 = vadd.f32 %v3149_v40, %v656_v20  ;;  %v2348_v22 = vpop.f32.mrb[53].mxu0  ;;  %2445 = vmatmul.mubr.msk.f32.gmra.mrb[50].mxu1 %vm722_vm3, %v705_v19 }
 0x157   : > { %2447 = vmatprep.mubr.msk.f32.mxu1 %vm2920_vm1, %v2919_v1 }
 0x158   : > { %v706_v23 = vmax.f32 %v657_v21, 0.0  ;;  %1124 = vst.msk [vmem:[%s3153_s14 + $0xd0] sm:$0xff] %vm722_vm3, %v657_v21 }
 0x159   : > { %v661_v24 = vpop.f32.mrb[54].mxu0 }
 0x15a   : > { %1093 = vst.msk [vmem:[%s3158_s24 + $0xd0] sm:$0xff] %vm722_vm3, %v706_v23  ;;  %v662_v25 = vadd.f32 %v3149_v40, %v661_v24  ;;  %v2351_v26 = vpop.f32.mrb[55].mxu0  ;;  %2448 = vmatmul.mubr.msk.f32.gmra.mrb[52].mxu1 %vm722_vm3, %v706_v23 }
 0x15b   : > { %2450 = vmatprep.mubr.msk.f32.mxu1 %vm2920_vm1, %v2919_v1 }
 0x15c   : > { %v707_v27 = vmax.f32 %v662_v25, 0.0  ;;  %1125 = vst.msk [vmem:[%s3153_s14 + $0xd8] sm:$0xff] %vm722_vm3, %v662_v25 }
 0x15d   : > { %v666_v28 = vpop.f32.mrb[56].mxu0 }
 0x15e   : > { %1094 = vst.msk [vmem:[%s3158_s24 + $0xd8] sm:$0xff] %vm722_vm3, %v707_v27  ;;  %v667_v29 = vadd.f32 %v3149_v40, %v666_v28  ;;  %v2354_v30 = vpop.f32.mrb[57].mxu0  ;;  %2451 = vmatmul.mubr.msk.f32.gmra.mrb[54].mxu1 %vm722_vm3, %v707_v27 }
 0x15f   : > { %2453 = vmatprep.mubr.msk.f32.mxu1 %vm2920_vm1, %v2919_v1 }
 0x160   : > { %v708_v31 = vmax.f32 %v667_v29, 0.0  ;;  %1126 = vst.msk [vmem:[%s3153_s14 + $0xe0] sm:$0xff] %vm722_vm3, %v667_v29 }
 0x161   : > { %v671_v32 = vpop.f32.mrb[58].mxu0 }
 0x162   : > { %1095 = vst.msk [vmem:[%s3158_s24 + $0xe0] sm:$0xff] %vm722_vm3, %v708_v31  ;;  %v672_v33 = vadd.f32 %v3149_v40, %v671_v32  ;;  %v2357_v34 = vpop.f32.mrb[59].mxu0  ;;  %2454 = vmatmul.mubr.msk.f32.gmra.mrb[56].mxu1 %vm722_vm3, %v708_v31 }
 0x163   : > { %2456 = vmatprep.mubr.msk.f32.mxu1 %vm2920_vm1, %v2919_v1 }
 0x164   : > { %v709_v35 = vmax.f32 %v672_v33, 0.0  ;;  %1127 = vst.msk [vmem:[%s3153_s14 + $0xe8] sm:$0xff] %vm722_vm3, %v672_v33 }
 0x165   : > { %v676_v36 = vpop.f32.mrb[60].mxu0 }
 0x166   : > { %1096 = vst.msk [vmem:[%s3158_s24 + $0xe8] sm:$0xff] %vm722_vm3, %v709_v35  ;;  %v677_v37 = vadd.f32 %v3149_v40, %v676_v36  ;;  %v2360_v38 = vpop.f32.mrb[61].mxu0  ;;  %2457 = vmatmul.mubr.msk.f32.gmra.mrb[58].mxu1 %vm722_vm3, %v709_v35 }
 0x167   : > { %2459 = vmatprep.mubr.msk.f32.mxu1 %vm2920_vm1, %v2919_v1 }
 0x168   : > { %v710_v39 = vmax.f32 %v677_v37, 0.0  ;;  %1128 = vst.msk [vmem:[%s3153_s14 + $0xf0] sm:$0xff] %vm722_vm3, %v677_v37 }
 0x16a   : > { %1097 = vst.msk [vmem:[%s3158_s24 + $0xf0] sm:$0xff] %vm722_vm3, %v710_v39  ;;  %2460 = vmatmul.mubr.msk.f32.gmra.mrb[60].mxu1 %vm722_vm3, %v710_v39 }
 0x1c5   : > { %v882_v42 = vpop.f32.mrb[0].mxu1 }
 0x1c6   : > { %v883_v40 = vadd.f32 %v3406_v41, %v882_v42  ;;  %v2371_v43 = vpop.f32.mrb[1].mxu1 }
 0x1c8   : > { %1036 = vst.msk [vmem:[%s3410_s17] sm:$0xff] %vm362_vm2, %v883_v40 }
 0x1c9   : > { %v887_v1 = vpop.f32.mrb[2].mxu1 }
 0x1ca   : > { %v888_v44 = vadd.f32 %v3406_v41, %v887_v1  ;;  %v2374_v45 = vpop.f32.mrb[3].mxu1 }
 0x1cc   : > { %1037 = vst.msk [vmem:[%s3410_s17 + $0x8] sm:$0xff] %vm362_vm2, %v888_v44 }
 0x1cd   : > { %v892_v46 = vpop.f32.mrb[4].mxu1 }
 0x1ce   : > { %v893_v47 = vadd.f32 %v3406_v41, %v892_v46  ;;  %v2377_v48 = vpop.f32.mrb[5].mxu1 }
 0x1d0   : > { %1038 = vst.msk [vmem:[%s3410_s17 + $0x10] sm:$0xff] %vm362_vm2, %v893_v47 }
 0x1d1   : > { %v897_v49 = vpop.f32.mrb[6].mxu1 }
 0x1d2   : > { %v898_v50 = vadd.f32 %v3406_v41, %v897_v49  ;;  %v2380_v51 = vpop.f32.mrb[7].mxu1 }
 0x1d4   : > { %1039 = vst.msk [vmem:[%s3410_s17 + $0x18] sm:$0xff] %vm362_vm2, %v898_v50 }
 0x1d5   : > { %v902_v52 = vpop.f32.mrb[8].mxu1 }
 0x1d6   : > { %v903_v53 = vadd.f32 %v3406_v41, %v902_v52  ;;  %v2383_v54 = vpop.f32.mrb[9].mxu1 }
 0x1d8   : > { %1040 = vst.msk [vmem:[%s3410_s17 + $0x20] sm:$0xff] %vm362_vm2, %v903_v53 }
 0x1d9   : > { %v907_v55 = vpop.f32.mrb[10].mxu1 }
 0x1da   : > { %v908_v56 = vadd.f32 %v3406_v41, %v907_v55  ;;  %v2386_v57 = vpop.f32.mrb[11].mxu1 }
 0x1dc   : > { %1041 = vst.msk [vmem:[%s3410_s17 + $0x28] sm:$0xff] %vm362_vm2, %v908_v56 }
 0x1dd   : > { %v912_v58 = vpop.f32.mrb[12].mxu1 }
 0x1de   : > { %v913_v59 = vadd.f32 %v3406_v41, %v912_v58  ;;  %v2389_v60 = vpop.f32.mrb[13].mxu1 }
 0x1e0   : > { %1042 = vst.msk [vmem:[%s3410_s17 + $0x30] sm:$0xff] %vm362_vm2, %v913_v59 }
 0x1e1   : > { %v917_v61 = vpop.f32.mrb[14].mxu1 }
 0x1e2   : > { %v918_v62 = vadd.f32 %v3406_v41, %v917_v61  ;;  %v2392_v63 = vpop.f32.mrb[15].mxu1 }
 0x1e4   : > { %1043 = vst.msk [vmem:[%s3410_s17 + $0x38] sm:$0xff] %vm362_vm2, %v918_v62 }
 0x1e5   : > { %v922_v0 = vpop.f32.mrb[16].mxu1 }
 0x1e6   : > { %v923_v2 = vadd.f32 %v3406_v41, %v922_v0  ;;  %v2395_v3 = vpop.f32.mrb[17].mxu1 }
 0x1e8   : > { %1044 = vst.msk [vmem:[%s3410_s17 + $0x40] sm:$0xff] %vm362_vm2, %v923_v2 }
 0x1e9   : > { %v927_v4 = vpop.f32.mrb[18].mxu1 }
 0x1ea   : > { %v928_v5 = vadd.f32 %v3406_v41, %v927_v4  ;;  %v2398_v6 = vpop.f32.mrb[19].mxu1 }
 0x1ec   : > { %1045 = vst.msk [vmem:[%s3410_s17 + $0x48] sm:$0xff] %vm362_vm2, %v928_v5 }
 0x1ed   : > { %v932_v7 = vpop.f32.mrb[20].mxu1 }
 0x1ee   : > { %v933_v8 = vadd.f32 %v3406_v41, %v932_v7  ;;  %v2401_v9 = vpop.f32.mrb[21].mxu1 }
 0x1f0   : > { %1046 = vst.msk [vmem:[%s3410_s17 + $0x50] sm:$0xff] %vm362_vm2, %v933_v8 }
 0x1f1   : > { %v937_v10 = vpop.f32.mrb[22].mxu1 }
 0x1f2   : > { %v938_v11 = vadd.f32 %v3406_v41, %v937_v10  ;;  %v2404_v12 = vpop.f32.mrb[23].mxu1 }
 0x1f4   : > { %1047 = vst.msk [vmem:[%s3410_s17 + $0x58] sm:$0xff] %vm362_vm2, %v938_v11 }
 0x1f5   : > { %v942_v13 = vpop.f32.mrb[24].mxu1 }
 0x1f6   : > { %v943_v14 = vadd.f32 %v3406_v41, %v942_v13  ;;  %v2407_v15 = vpop.f32.mrb[25].mxu1 }
 0x1f8   : > { %1048 = vst.msk [vmem:[%s3410_s17 + $0x60] sm:$0xff] %vm362_vm2, %v943_v14 }
 0x1f9   : > { %v947_v16 = vpop.f32.mrb[26].mxu1 }
 0x1fa   : > { %v948_v17 = vadd.f32 %v3406_v41, %v947_v16  ;;  %v2410_v18 = vpop.f32.mrb[27].mxu1 }
 0x1fc   : > { %1049 = vst.msk [vmem:[%s3410_s17 + $0x68] sm:$0xff] %vm362_vm2, %v948_v17 }
 0x1fd   : > { %v952_v19 = vpop.f32.mrb[28].mxu1 }
 0x1fe   : > { %v953_v20 = vadd.f32 %v3406_v41, %v952_v19  ;;  %v2413_v21 = vpop.f32.mrb[29].mxu1 }
 0x200   : > { %1050 = vst.msk [vmem:[%s3410_s17 + $0x70] sm:$0xff] %vm362_vm2, %v953_v20 }
 0x201   : > { %v957_v22 = vpop.f32.mrb[30].mxu1 }
 0x202   : > { %v958_v23 = vadd.f32 %v3406_v41, %v957_v22  ;;  %v2416_v24 = vpop.f32.mrb[31].mxu1 }
 0x204   : > { %1051 = vst.msk [vmem:[%s3410_s17 + $0x78] sm:$0xff] %vm362_vm2, %v958_v23 }
 0x205   : > { %v962_v25 = vpop.f32.mrb[32].mxu1 }
 0x206   : > { %v963_v26 = vadd.f32 %v3406_v41, %v962_v25  ;;  %v2419_v27 = vpop.f32.mrb[33].mxu1 }
 0x208   : > { %1052 = vst.msk [vmem:[%s3410_s17 + $0x80] sm:$0xff] %vm362_vm2, %v963_v26 }
 0x209   : > { %v967_v28 = vpop.f32.mrb[34].mxu1 }
 0x20a   : > { %v968_v29 = vadd.f32 %v3406_v41, %v967_v28  ;;  %v2422_v30 = vpop.f32.mrb[35].mxu1 }
 0x20c   : > { %1053 = vst.msk [vmem:[%s3410_s17 + $0x88] sm:$0xff] %vm362_vm2, %v968_v29 }
 0x20d   : > { %v972_v31 = vpop.f32.mrb[36].mxu1 }
 0x20e   : > { %v973_v32 = vadd.f32 %v3406_v41, %v972_v31  ;;  %v2425_v33 = vpop.f32.mrb[37].mxu1 }
 0x210   : > { %1054 = vst.msk [vmem:[%s3410_s17 + $0x90] sm:$0xff] %vm362_vm2, %v973_v32 }
 0x211   : > { %v977_v34 = vpop.f32.mrb[38].mxu1 }
 0x212   : > { %v978_v35 = vadd.f32 %v3406_v41, %v977_v34  ;;  %v2428_v36 = vpop.f32.mrb[39].mxu1 }
 0x214   : > { %1055 = vst.msk [vmem:[%s3410_s17 + $0x98] sm:$0xff] %vm362_vm2, %v978_v35 }
 0x215   : > { %v982_v37 = vpop.f32.mrb[40].mxu1 }
 0x216   : > { %v983_v38 = vadd.f32 %v3406_v41, %v982_v37  ;;  %v2431_v39 = vpop.f32.mrb[41].mxu1 }
 0x218   : > { %1056 = vst.msk [vmem:[%s3410_s17 + $0xa0] sm:$0xff] %vm362_vm2, %v983_v38 }
 0x219   : > { %v987_v42 = vpop.f32.mrb[42].mxu1 }
 0x21a   : > { %v988_v40 = vadd.f32 %v3406_v41, %v987_v42  ;;  %v2434_v43 = vpop.f32.mrb[43].mxu1 }
 0x21c   : > { %1057 = vst.msk [vmem:[%s3410_s17 + $0xa8] sm:$0xff] %vm362_vm2, %v988_v40 }
 0x21d   : > { %v992_v1 = vpop.f32.mrb[44].mxu1 }
 0x21e   : > { %v993_v44 = vadd.f32 %v3406_v41, %v992_v1  ;;  %v2437_v45 = vpop.f32.mrb[45].mxu1 }
 0x220   : > { %1058 = vst.msk [vmem:[%s3410_s17 + $0xb0] sm:$0xff] %vm362_vm2, %v993_v44 }
 0x221   : > { %v997_v46 = vpop.f32.mrb[46].mxu1 }
 0x222   : > { %v998_v47 = vadd.f32 %v3406_v41, %v997_v46  ;;  %v2440_v48 = vpop.f32.mrb[47].mxu1 }
 0x224   : > { %1059 = vst.msk [vmem:[%s3410_s17 + $0xb8] sm:$0xff] %vm362_vm2, %v998_v47 }
 0x225   : > { %v1002_v49 = vpop.f32.mrb[48].mxu1 }
 0x226   : > { %v1003_v50 = vadd.f32 %v3406_v41, %v1002_v49  ;;  %v2443_v51 = vpop.f32.mrb[49].mxu1 }
 0x228   : > { %1060 = vst.msk [vmem:[%s3410_s17 + $0xc0] sm:$0xff] %vm362_vm2, %v1003_v50 }
 0x229   : > { %v1007_v52 = vpop.f32.mrb[50].mxu1 }
 0x22a   : > { %v1008_v53 = vadd.f32 %v3406_v41, %v1007_v52  ;;  %v2446_v54 = vpop.f32.mrb[51].mxu1 }
 0x22c   : > { %1061 = vst.msk [vmem:[%s3410_s17 + $0xc8] sm:$0xff] %vm362_vm2, %v1008_v53 }
 0x22d   : > { %v1012_v55 = vpop.f32.mrb[52].mxu1 }
 0x22e   : > { %v1013_v56 = vadd.f32 %v3406_v41, %v1012_v55  ;;  %v2449_v57 = vpop.f32.mrb[53].mxu1 }
 0x230   : > { %1062 = vst.msk [vmem:[%s3410_s17 + $0xd0] sm:$0xff] %vm362_vm2, %v1013_v56 }
 0x231   : > { %v1017_v58 = vpop.f32.mrb[54].mxu1 }
 0x232   : > { %v1018_v59 = vadd.f32 %v3406_v41, %v1017_v58  ;;  %v2452_v60 = vpop.f32.mrb[55].mxu1 }
 0x234   : > { %1063 = vst.msk [vmem:[%s3410_s17 + $0xd8] sm:$0xff] %vm362_vm2, %v1018_v59 }
 0x235   : > { %v1022_v61 = vpop.f32.mrb[56].mxu1 }
 0x236   : > { %v1023_v62 = vadd.f32 %v3406_v41, %v1022_v61  ;;  %v2455_v63 = vpop.f32.mrb[57].mxu1 }
 0x238   : > { %1064 = vst.msk [vmem:[%s3410_s17 + $0xe0] sm:$0xff] %vm362_vm2, %v1023_v62 }
 0x239   : > { %v1027_v0 = vpop.f32.mrb[58].mxu1 }
 0x23a   : > { %v1028_v2 = vadd.f32 %v3406_v41, %v1027_v0  ;;  %v2458_v3 = vpop.f32.mrb[59].mxu1  ;;  %1143 = sbr.rel (!%p2987_p4) target bundleno = 645 (0x285), region = 44 }
 0x23c   : > { %1065 = vst.msk [vmem:[%s3410_s17 + $0xe8] sm:$0xff] %vm362_vm2, %v1028_v2 }
 0x23d   : > { %v1032_v4 = vpop.f32.mrb[60].mxu1 }
 0x23e   : > { %v1033_v5 = vadd.f32 %v3406_v41, %v1032_v4  ;;  %v2461_v6 = vpop.f32.mrb[61].mxu1 }
 0x240   : > { %1066 = vst.msk [vmem:[%s3410_s17 + $0xf0] sm:$0xff] %vm362_vm2, %v1033_v5 }
 0x241   : > { %s3903_s18 = smov (!%p1146_p8, %s1145_s18), 31 }
 0x242   : > { %s2164_s23 = sshll.u32 %s3903_s18, 7 }
 0x243   : > { %p2167_p9 = scmp.eq.s32.totalorder %s2164_s23, 0 }
 0x244   : > { %2691 = sdivrem.u32 (!%p2167_p9), %s3903_s18, 31 }
 0x245   : > { %1154 = sbr.rel (%p2167_p9) target bundleno = 645 (0x285), region = 48 }
 0x24d   : > { %s3517_s26 = spop.drf %2691 }
 0x24e   : > { %p2168_p10 = scmp.le.s32.totalorder %s3517_s26, 0 }
 0x24f   : > { %s3884_s29 = smov (!%p2168_p10), %s3511_s22  ;;  %s3885_s30 = smov (!%p2168_p10), %s3410_s17 }
 0x250   : > { %1976 = sbr.rel (%p2168_p10) target bundleno = 616 (0x268), region = 268  ;;  %s3526_s10 = smov (!%p2168_p10), 0  }
 0x251   : > { %s3528_s11 = smov (!%p2168_p10), 0  }
 0x257 LB: >> { %v1278_v41 = vld [vmem:[%s2829_s30] sm:$0xff]  ;;  %v1280_v7 = vld [vmem:[%s2829_s30 + $0x8] sm:$0xff]  ;;  %v1282_v8 = vld [vmem:[%s2829_s30 + $0x10] sm:$0xff]  ;;  %s1340_s13 = sadd.s32 1, %s2833_s10  ;;  %s1272_s11 = sadd.s32 1, %s2837_s11   ;;  %s2837_s11 = sphi %s3528_s11, %s1272_s11   ;;  %s2833_s10 = sphi %s3526_s10, %s3888_s10   ;;  %s2829_s30 = sphi %s3885_s30, %s3887_s30   ;;  %s2825_s29 = sphi %s3884_s29, %s3886_s29  }
 0x258   : >> { %1279 = vst [vmem:[%s2825_s29] sm:$0xff] %v1278_v41  ;;  %1281 = vst [vmem:[%s2825_s29 + $0x8] sm:$0xff] %v1280_v7  ;;  %v1284_v9 = vld [vmem:[%s2829_s30 + $0x18] sm:$0xff]  ;;  %v1286_v10 = vld [vmem:[%s2829_s30 + $0x20] sm:$0xff]  ;;  %p1341_p11 = scmp.ge.s32.totalorder %s1340_s13, %s3517_s26  ;;  %p1271_p12 = scmp.ge.s32.totalorder %s1272_s11, %s3517_s26 }
 0x259   : >> { %1283 = vst [vmem:[%s2825_s29 + $0x10] sm:$0xff] %v1282_v8  ;;  %v1288_v11 = vld [vmem:[%s2829_s30 + $0x28] sm:$0xff]  ;;  %1285 = vst [vmem:[%s2825_s29 + $0x18] sm:$0xff] %v1284_v9  ;;  %v1290_v12 = vld [vmem:[%s2829_s30 + $0x30] sm:$0xff] }
 0x25a   : >> { %1287 = vst [vmem:[%s2825_s29 + $0x20] sm:$0xff] %v1286_v10  ;;  %1289 = vst [vmem:[%s2825_s29 + $0x28] sm:$0xff] %v1288_v11  ;;  %v1292_v13 = vld [vmem:[%s2829_s30 + $0x38] sm:$0xff]  ;;  %v1294_v14 = vld [vmem:[%s2829_s30 + $0x40] sm:$0xff]  ;;  %s3905_s13 = smov (%p1341_p11, %s1340_s13), 0 }
 0x25b   : >> { %1291 = vst [vmem:[%s2825_s29 + $0x30] sm:$0xff] %v1290_v12  ;;  %1293 = vst [vmem:[%s2825_s29 + $0x38] sm:$0xff] %v1292_v13  ;;  %v1296_v15 = vld [vmem:[%s2829_s30 + $0x48] sm:$0xff]  ;;  %v1298_v16 = vld [vmem:[%s2829_s30 + $0x50] sm:$0xff]  ;;  %s1343_s15 = smul.u32 248, %s3905_s13  ;;  %s3888_s10 = smov %s3905_s13 }
 0x25c   : >> { %1295 = vst [vmem:[%s2825_s29 + $0x40] sm:$0xff] %v1294_v14  ;;  %v1300_v17 = vld [vmem:[%s2829_s30 + $0x58] sm:$0xff]  ;;  %1297 = vst [vmem:[%s2825_s29 + $0x48] sm:$0xff] %v1296_v15  ;;  %v1302_v18 = vld [vmem:[%s2829_s30 + $0x60] sm:$0xff] }
 0x25d   : >> { %1299 = vst [vmem:[%s2825_s29 + $0x50] sm:$0xff] %v1298_v16  ;;  %1301 = vst [vmem:[%s2825_s29 + $0x58] sm:$0xff] %v1300_v17  ;;  %v1304_v19 = vld [vmem:[%s2829_s30 + $0x68] sm:$0xff]  ;;  %v1306_v20 = vld [vmem:[%s2829_s30 + $0x70] sm:$0xff]  ;;  %s1345_s16 = scalar_lea.vmem %s3410_s17, %s1343_s15 [#allocation2]   ;;  %s1346_s19 = scalar_lea.vmem %s3511_s22, %s1343_s15  }
 0x25e   : >> { %1303 = vst [vmem:[%s2825_s29 + $0x60] sm:$0xff] %v1302_v18  ;;  %1305 = vst [vmem:[%s2825_s29 + $0x68] sm:$0xff] %v1304_v19  ;;  %v1308_v21 = vld [vmem:[%s2829_s30 + $0x78] sm:$0xff]  ;;  %v1310_v22 = vld [vmem:[%s2829_s30 + $0x80] sm:$0xff] }
 0x25f   : >> { %1307 = vst [vmem:[%s2825_s29 + $0x70] sm:$0xff] %v1306_v20  ;;  %v1312_v23 = vld [vmem:[%s2829_s30 + $0x88] sm:$0xff]  ;;  %1309 = vst [vmem:[%s2825_s29 + $0x78] sm:$0xff] %v1308_v21  ;;  %v1314_v24 = vld [vmem:[%s2829_s30 + $0x90] sm:$0xff] }
 0x260   : >> { %1311 = vst [vmem:[%s2825_s29 + $0x80] sm:$0xff] %v1310_v22  ;;  %1313 = vst [vmem:[%s2825_s29 + $0x88] sm:$0xff] %v1312_v23  ;;  %v1316_v25 = vld [vmem:[%s2829_s30 + $0x98] sm:$0xff]  ;;  %v1318_v26 = vld [vmem:[%s2829_s30 + $0xa0] sm:$0xff] }
 0x261   : >> { %1315 = vst [vmem:[%s2825_s29 + $0x90] sm:$0xff] %v1314_v24  ;;  %1317 = vst [vmem:[%s2825_s29 + $0x98] sm:$0xff] %v1316_v25  ;;  %v1320_v27 = vld [vmem:[%s2829_s30 + $0xa8] sm:$0xff]  ;;  %v1322_v28 = vld [vmem:[%s2829_s30 + $0xb0] sm:$0xff]  ;;  %1274 = sbr.rel (!%p1271_p12) target bundleno = 599 (0x257), region = 274 }
 0x262   : >> { %1319 = vst [vmem:[%s2825_s29 + $0xa0] sm:$0xff] %v1318_v26  ;;  %v1324_v29 = vld [vmem:[%s2829_s30 + $0xb8] sm:$0xff]  ;;  %1321 = vst [vmem:[%s2825_s29 + $0xa8] sm:$0xff] %v1320_v27  ;;  %v1326_v30 = vld [vmem:[%s2829_s30 + $0xc0] sm:$0xff] }
 0x263   : >> { %1323 = vst [vmem:[%s2825_s29 + $0xb0] sm:$0xff] %v1322_v28  ;;  %1325 = vst [vmem:[%s2825_s29 + $0xb8] sm:$0xff] %v1324_v29  ;;  %v1328_v31 = vld [vmem:[%s2829_s30 + $0xc8] sm:$0xff]  ;;  %v1330_v32 = vld [vmem:[%s2829_s30 + $0xd0] sm:$0xff] }
 0x264   : >> { %1327 = vst [vmem:[%s2825_s29 + $0xc0] sm:$0xff] %v1326_v30  ;;  %1329 = vst [vmem:[%s2825_s29 + $0xc8] sm:$0xff] %v1328_v31  ;;  %v1332_v33 = vld [vmem:[%s2829_s30 + $0xd8] sm:$0xff]  ;;  %v1334_v34 = vld [vmem:[%s2829_s30 + $0xe0] sm:$0xff] }
 0x265   : >> { %1331 = vst [vmem:[%s2825_s29 + $0xd0] sm:$0xff] %v1330_v32  ;;  %v1336_v35 = vld [vmem:[%s2829_s30 + $0xe8] sm:$0xff]  ;;  %1333 = vst [vmem:[%s2825_s29 + $0xd8] sm:$0xff] %v1332_v33  ;;  %v1338_v36 = vld [vmem:[%s2829_s30 + $0xf0] sm:$0xff]  ;;  %s3887_s30 = smov %s1345_s16 }
 0x266   : >> { %1335 = vst [vmem:[%s2825_s29 + $0xe0] sm:$0xff] %v1334_v34  ;;  %1337 = vst [vmem:[%s2825_s29 + $0xe8] sm:$0xff] %v1336_v35 }
 0x267   : >> { %1339 = vst [vmem:[%s2825_s29 + $0xf0] sm:$0xff] %v1338_v36  ;;  %s3886_s29 = smov %s1346_s19 }
 0x268 PF: > { %2693 = sdivrem.u32 %s3903_s18, 31 }
 0x269   : > { %s2169_s20 = smul.u32 248, %s3517_s26 }
 0x26b   : > { %s1351_s21 = scalar_lea.vmem %s3410_s17, %s2169_s20 [#allocation2]   ;;  %s1353_s23 = scalar_lea.vmem %s3511_s22, %s2169_s20  }
 0x271   : > { %s2694_s15 = spop.drf %2693 }
 0x272   : > { %p2171_p13 = scmp.le.s32.totalorder %s2694_s15, 0 }
 0x273   : > { %s2839_s19 = smov (!%p2171_p13), %s1353_s23   ;;  %s2843_s0 = smov (!%p2171_p13), %s1351_s21  }
 0x274   : > { %1990 = sbr.rel (%p2171_p13) target bundleno = 645 (0x285), region = 279  ;;  %s2847_s16 = smov (!%p2171_p13), 0  }
 0x275   : > { %s2851_s1 = smov (!%p2171_p13), 0  }
 0x27b LB: >> { %v1363_v37 = vld [vmem:[%s2845_s0] sm:$0xff]  ;;  %s1365_s29 = sadd.s32 1, %s2849_s16  ;;  %s1357_s1 = sadd.s32 1, %s2853_s1   ;;  %s2853_s1 = sphi %s2851_s1, %s1357_s1   ;;  %s2849_s16 = sphi %s2847_s16, %s2848_s16   ;;  %s2845_s0 = sphi %s2843_s0, %s1370_s0   ;;  %s2841_s19 = sphi %s2839_s19, %s1371_s19  }
 0x27c   : >> { %1364 = vst [vmem:[%s2841_s19] sm:$0xff] %v1363_v37  ;;  %p1366_p0 = scmp.ge.s32.totalorder %s1365_s29, %s2694_s15  ;;  %p1356_p1 = scmp.ge.s32.totalorder %s1357_s1, %s2694_s15 }
 0x27e   : >> { %s3907_s29 = smov (%p1366_p0, %s1365_s29), 0  ;;  %1359 = sbr.rel (!%p1356_p1) target bundleno = 635 (0x27b), region = 285 }
 0x27f   : >> { %s2172_s17 = sshll.u32 %s3907_s29, 3  ;;  %s2848_s16 = smov %s3907_s29  }
 0x280   : >> { %s1370_s0 = scalar_lea.vmem %s1351_s21, %s2172_s17 [#allocation2]   ;;  %s1371_s19 = scalar_lea.vmem %s1353_s23, %s2172_s17  }
 0x285 PF: > { %1377 = sbr.rel (!%p2987_p4) target bundleno = 720 (0x2d0), region = 96  ;;  %s1379_s18 = ssub.s32 (%p2987_p4), 63, %s2995_s12 }
 0x286   : > { %s2197_s22 = smul.u32 (%p2987_p4), 248, %s2975_s27  ;;  %p1380_p2 = scmp.lt.s32.totalorder (%p2987_p4), %s1379_s18, 31 }
 0x288   : > { %s3630_s10 = scalar_lea.vmem (%p2987_p4), %s3877_s6, %s2197_s22  }
 0x28c   : > { %s3909_s18 = smov (!%p1380_p2, %s1379_s18), 31 }
 0x28d   : > { %s2174_s0 = sshll.u32 %s3909_s18, 7 }
 0x28e   : > { %p2177_p3 = scmp.eq.s32.totalorder %s2174_s0, 0 }
 0x28f   : > { %2695 = sdivrem.u32 (!%p2177_p3), %s3909_s18, 31 }
 0x290   : > { %1388 = sbr.rel (%p2177_p3) target bundleno = 720 (0x2d0), region = 100 }
 0x298   : > { %s3636_s1 = spop.drf %2695 }
 0x299   : > { %p2178_p5 = scmp.le.s32.totalorder %s3636_s1, 0 }
 0x29a   : > { %s3889_s11 = smov (!%p2178_p5), %s3630_s10  ;;  %s3890_s13 = smov (!%p2178_p5), %s3158_s24 }
 0x29b   : > { %2004 = sbr.rel (%p2178_p5) target bundleno = 691 (0x2b3), region = 290  ;;  %s3645_s20 = smov (!%p2178_p5), 0  }
 0x29c   : > { %s3647_s21 = smov (!%p2178_p5), 0  }
 0x2a2 LB: >> { %v1512_v38 = vld [vmem:[%s2861_s13] sm:$0xff]  ;;  %v1514_v39 = vld [vmem:[%s2861_s13 + $0x8] sm:$0xff]  ;;  %v1516_v42 = vld [vmem:[%s2861_s13 + $0x10] sm:$0xff]  ;;  %s1574_s23 = sadd.s32 1, %s2865_s20  ;;  %s1506_s21 = sadd.s32 1, %s2869_s21   ;;  %s2869_s21 = sphi %s3647_s21, %s1506_s21   ;;  %s2865_s20 = sphi %s3645_s20, %s3893_s20   ;;  %s2861_s13 = sphi %s3890_s13, %s3892_s13   ;;  %s2857_s11 = sphi %s3889_s11, %s3891_s11  }
 0x2a3   : >> { %1513 = vst [vmem:[%s2857_s11] sm:$0xff] %v1512_v38  ;;  %1515 = vst [vmem:[%s2857_s11 + $0x8] sm:$0xff] %v1514_v39  ;;  %v1518_v40 = vld [vmem:[%s2861_s13 + $0x18] sm:$0xff]  ;;  %v1520_v43 = vld [vmem:[%s2861_s13 + $0x20] sm:$0xff]  ;;  %p1575_p6 = scmp.ge.s32.totalorder %s1574_s23, %s3636_s1  ;;  %p1505_p7 = scmp.ge.s32.totalorder %s1506_s21, %s3636_s1 }
 0x2a4   : >> { %1517 = vst [vmem:[%s2857_s11 + $0x10] sm:$0xff] %v1516_v42  ;;  %v1522_v1 = vld [vmem:[%s2861_s13 + $0x28] sm:$0xff]  ;;  %1519 = vst [vmem:[%s2857_s11 + $0x18] sm:$0xff] %v1518_v40  ;;  %v1524_v44 = vld [vmem:[%s2861_s13 + $0x30] sm:$0xff] }
 0x2a5   : >> { %1521 = vst [vmem:[%s2857_s11 + $0x20] sm:$0xff] %v1520_v43  ;;  %1523 = vst [vmem:[%s2857_s11 + $0x28] sm:$0xff] %v1522_v1  ;;  %v1526_v45 = vld [vmem:[%s2861_s13 + $0x38] sm:$0xff]  ;;  %v1528_v46 = vld [vmem:[%s2861_s13 + $0x40] sm:$0xff]  ;;  %s3911_s23 = smov (%p1575_p6, %s1574_s23), 0 }
 0x2a6   : >> { %1525 = vst [vmem:[%s2857_s11 + $0x30] sm:$0xff] %v1524_v44  ;;  %1527 = vst [vmem:[%s2857_s11 + $0x38] sm:$0xff] %v1526_v45  ;;  %v1530_v47 = vld [vmem:[%s2861_s13 + $0x48] sm:$0xff]  ;;  %v1532_v48 = vld [vmem:[%s2861_s13 + $0x50] sm:$0xff]  ;;  %s1577_s15 = smul.u32 248, %s3911_s23  ;;  %s3893_s20 = smov %s3911_s23 }
 0x2a7   : >> { %1529 = vst [vmem:[%s2857_s11 + $0x40] sm:$0xff] %v1528_v46  ;;  %v1534_v49 = vld [vmem:[%s2861_s13 + $0x58] sm:$0xff]  ;;  %1531 = vst [vmem:[%s2857_s11 + $0x48] sm:$0xff] %v1530_v47  ;;  %v1536_v50 = vld [vmem:[%s2861_s13 + $0x60] sm:$0xff] }
 0x2a8   : >> { %1533 = vst [vmem:[%s2857_s11 + $0x50] sm:$0xff] %v1532_v48  ;;  %1535 = vst [vmem:[%s2857_s11 + $0x58] sm:$0xff] %v1534_v49  ;;  %v1538_v51 = vld [vmem:[%s2861_s13 + $0x68] sm:$0xff]  ;;  %v1540_v52 = vld [vmem:[%s2861_s13 + $0x70] sm:$0xff]  ;;  %s1579_s19 = scalar_lea.vmem %s3158_s24, %s1577_s15 [#allocation3]   ;;  %s1580_s16 = scalar_lea.vmem %s3630_s10, %s1577_s15  }
 0x2a9   : >> { %1537 = vst [vmem:[%s2857_s11 + $0x60] sm:$0xff] %v1536_v50  ;;  %1539 = vst [vmem:[%s2857_s11 + $0x68] sm:$0xff] %v1538_v51  ;;  %v1542_v53 = vld [vmem:[%s2861_s13 + $0x78] sm:$0xff]  ;;  %v1544_v54 = vld [vmem:[%s2861_s13 + $0x80] sm:$0xff] }
 0x2aa   : >> { %1541 = vst [vmem:[%s2857_s11 + $0x70] sm:$0xff] %v1540_v52  ;;  %v1546_v55 = vld [vmem:[%s2861_s13 + $0x88] sm:$0xff]  ;;  %1543 = vst [vmem:[%s2857_s11 + $0x78] sm:$0xff] %v1542_v53  ;;  %v1548_v56 = vld [vmem:[%s2861_s13 + $0x90] sm:$0xff] }
 0x2ab   : >> { %1545 = vst [vmem:[%s2857_s11 + $0x80] sm:$0xff] %v1544_v54  ;;  %1547 = vst [vmem:[%s2857_s11 + $0x88] sm:$0xff] %v1546_v55  ;;  %v1550_v57 = vld [vmem:[%s2861_s13 + $0x98] sm:$0xff]  ;;  %v1552_v58 = vld [vmem:[%s2861_s13 + $0xa0] sm:$0xff] }
 0x2ac   : >> { %1549 = vst [vmem:[%s2857_s11 + $0x90] sm:$0xff] %v1548_v56  ;;  %1551 = vst [vmem:[%s2857_s11 + $0x98] sm:$0xff] %v1550_v57  ;;  %v1554_v59 = vld [vmem:[%s2861_s13 + $0xa8] sm:$0xff]  ;;  %v1556_v60 = vld [vmem:[%s2861_s13 + $0xb0] sm:$0xff]  ;;  %1508 = sbr.rel (!%p1505_p7) target bundleno = 674 (0x2a2), region = 296 }
 0x2ad   : >> { %1553 = vst [vmem:[%s2857_s11 + $0xa0] sm:$0xff] %v1552_v58  ;;  %v1558_v61 = vld [vmem:[%s2861_s13 + $0xb8] sm:$0xff]  ;;  %1555 = vst [vmem:[%s2857_s11 + $0xa8] sm:$0xff] %v1554_v59  ;;  %v1560_v62 = vld [vmem:[%s2861_s13 + $0xc0] sm:$0xff] }
 0x2ae   : >> { %1557 = vst [vmem:[%s2857_s11 + $0xb0] sm:$0xff] %v1556_v60  ;;  %1559 = vst [vmem:[%s2857_s11 + $0xb8] sm:$0xff] %v1558_v61  ;;  %v1562_v63 = vld [vmem:[%s2861_s13 + $0xc8] sm:$0xff]  ;;  %v1564_v0 = vld [vmem:[%s2861_s13 + $0xd0] sm:$0xff] }
 0x2af   : >> { %1561 = vst [vmem:[%s2857_s11 + $0xc0] sm:$0xff] %v1560_v62  ;;  %1563 = vst [vmem:[%s2857_s11 + $0xc8] sm:$0xff] %v1562_v63  ;;  %v1566_v2 = vld [vmem:[%s2861_s13 + $0xd8] sm:$0xff]  ;;  %v1568_v3 = vld [vmem:[%s2861_s13 + $0xe0] sm:$0xff] }
 0x2b0   : >> { %1565 = vst [vmem:[%s2857_s11 + $0xd0] sm:$0xff] %v1564_v0  ;;  %v1570_v4 = vld [vmem:[%s2861_s13 + $0xe8] sm:$0xff]  ;;  %1567 = vst [vmem:[%s2857_s11 + $0xd8] sm:$0xff] %v1566_v2  ;;  %v1572_v5 = vld [vmem:[%s2861_s13 + $0xf0] sm:$0xff]  ;;  %s3892_s13 = smov %s1579_s19 }
 0x2b1   : >> { %1569 = vst [vmem:[%s2857_s11 + $0xe0] sm:$0xff] %v1568_v3  ;;  %1571 = vst [vmem:[%s2857_s11 + $0xe8] sm:$0xff] %v1570_v4 }
 0x2b2   : >> { %1573 = vst [vmem:[%s2857_s11 + $0xf0] sm:$0xff] %v1572_v5  ;;  %s3891_s11 = smov %s1580_s16 }
 0x2b3 PF: > { %2697 = sdivrem.u32 %s3909_s18, 31 }
 0x2b4   : > { %s2179_s29 = smul.u32 248, %s3636_s1 }
 0x2b6   : > { %s1585_s17 = scalar_lea.vmem %s3158_s24, %s2179_s29 [#allocation3]   ;;  %s1587_s22 = scalar_lea.vmem %s3630_s10, %s2179_s29  }
 0x2bc   : > { %s2698_s26 = spop.drf %2697 }
 0x2bd   : > { %p2181_p8 = scmp.le.s32.totalorder %s2698_s26, 0 }
 0x2be   : > { %s2871_s30 = smov (!%p2181_p8), %s1587_s22   ;;  %s2875_s0 = smov (!%p2181_p8), %s1585_s17  }
 0x2bf   : > { %2018 = sbr.rel (%p2181_p8) target bundleno = 720 (0x2d0), region = 301  ;;  %s2879_s15 = smov (!%p2181_p8), 0  }
 0x2c0   : > { %s2883_s19 = smov (!%p2181_p8), 0  }
 0x2c6 LB: >> { %v1597_v6 = vld [vmem:[%s2877_s0] sm:$0xff]  ;;  %s1599_s11 = sadd.s32 1, %s2881_s15  ;;  %s1591_s19 = sadd.s32 1, %s2885_s19   ;;  %s2885_s19 = sphi %s2883_s19, %s1591_s19   ;;  %s2881_s15 = sphi %s2879_s15, %s2880_s15   ;;  %s2877_s0 = sphi %s2875_s0, %s1604_s0   ;;  %s2873_s30 = sphi %s2871_s30, %s1605_s30  }
 0x2c7   : >> { %1598 = vst [vmem:[%s2873_s30] sm:$0xff] %v1597_v6  ;;  %p1600_p9 = scmp.ge.s32.totalorder %s1599_s11, %s2698_s26  ;;  %p1590_p10 = scmp.ge.s32.totalorder %s1591_s19, %s2698_s26 }
 0x2c9   : >> { %s3913_s11 = smov (%p1600_p9, %s1599_s11), 0  ;;  %1593 = sbr.rel (!%p1590_p10) target bundleno = 710 (0x2c6), region = 307 }
 0x2ca   : >> { %s2182_s24 = sshll.u32 %s3913_s11, 3  ;;  %s2880_s15 = smov %s3913_s11  }
 0x2cb   : >> { %s1604_s0 = scalar_lea.vmem %s1585_s17, %s2182_s24 [#allocation3]   ;;  %s1605_s30 = scalar_lea.vmem %s1587_s22, %s2182_s24  }
 0x2d0 PF: > { %1611 = sbr.rel (!%p2987_p4) target bundleno = 795 (0x31b), region = 148  ;;  %s1613_s18 = ssub.s32 (%p2987_p4), 63, %s2995_s12 }
 0x2d1   : > { %s2198_s10 = smul.u32 (%p2987_p4), 248, %s2975_s27  ;;  %p1614_p11 = scmp.lt.s32.totalorder (%p2987_p4), %s1613_s18, 31 }
 0x2d3   : > { %s3749_s20 = scalar_lea.vmem (%p2987_p4), %s3878_s7, %s2198_s10  }
 0x2d7   : > { %s3915_s18 = smov (!%p1614_p11, %s1613_s18), 31 }
 0x2d8   : > { %s2184_s21 = sshll.u32 %s3915_s18, 7 }
 0x2d9   : > { %p2187_p12 = scmp.eq.s32.totalorder %s2184_s21, 0 }
 0x2da   : > { %2699 = sdivrem.u32 (!%p2187_p12), %s3915_s18, 31 }
 0x2db   : > { %1622 = sbr.rel (%p2187_p12) target bundleno = 795 (0x31b), region = 152 }
 0x2e3   : > { %s3755_s9 = spop.drf %2699 }
 0x2e4   : > { %p2188_p4 = scmp.le.s32.totalorder %s3755_s9, 0 }
 0x2e5   : > { %s3894_s27 = smov (!%p2188_p4), %s3749_s20  ;;  %s3895_s12 = smov (!%p2188_p4), %s3153_s14 }
 0x2e6   : > { %2032 = sbr.rel (%p2188_p4) target bundleno = 766 (0x2fe), region = 312  ;;  %s3764_s23 = smov (!%p2188_p4), 0  }
 0x2e7   : > { %s3766_s16 = smov (!%p2188_p4), 0  }
 0x2ed LB: >> { %v1746_v41 = vld [vmem:[%s2893_s12] sm:$0xff]  ;;  %v1748_v7 = vld [vmem:[%s2893_s12 + $0x8] sm:$0xff]  ;;  %v1750_v8 = vld [vmem:[%s2893_s12 + $0x10] sm:$0xff]  ;;  %s1808_s29 = sadd.s32 1, %s2897_s23  ;;  %s1740_s16 = sadd.s32 1, %s2901_s16   ;;  %s2901_s16 = sphi %s3766_s16, %s1740_s16   ;;  %s2897_s23 = sphi %s3764_s23, %s3898_s23   ;;  %s2893_s12 = sphi %s3895_s12, %s3897_s12   ;;  %s2889_s27 = sphi %s3894_s27, %s3896_s27  }
 0x2ee   : >> { %1747 = vst [vmem:[%s2889_s27] sm:$0xff] %v1746_v41  ;;  %1749 = vst [vmem:[%s2889_s27 + $0x8] sm:$0xff] %v1748_v7  ;;  %v1752_v9 = vld [vmem:[%s2893_s12 + $0x18] sm:$0xff]  ;;  %v1754_v10 = vld [vmem:[%s2893_s12 + $0x20] sm:$0xff]  ;;  %p1809_p13 = scmp.ge.s32.totalorder %s1808_s29, %s3755_s9  ;;  %p1739_p0 = scmp.ge.s32.totalorder %s1740_s16, %s3755_s9 }
 0x2ef   : >> { %1751 = vst [vmem:[%s2889_s27 + $0x10] sm:$0xff] %v1750_v8  ;;  %v1756_v11 = vld [vmem:[%s2893_s12 + $0x28] sm:$0xff]  ;;  %1753 = vst [vmem:[%s2889_s27 + $0x18] sm:$0xff] %v1752_v9  ;;  %v1758_v12 = vld [vmem:[%s2893_s12 + $0x30] sm:$0xff] }
 0x2f0   : >> { %1755 = vst [vmem:[%s2889_s27 + $0x20] sm:$0xff] %v1754_v10  ;;  %1757 = vst [vmem:[%s2889_s27 + $0x28] sm:$0xff] %v1756_v11  ;;  %v1760_v13 = vld [vmem:[%s2893_s12 + $0x38] sm:$0xff]  ;;  %v1762_v14 = vld [vmem:[%s2893_s12 + $0x40] sm:$0xff]  ;;  %s3917_s29 = smov (%p1809_p13, %s1808_s29), 0 }
 0x2f1   : >> { %1759 = vst [vmem:[%s2889_s27 + $0x30] sm:$0xff] %v1758_v12  ;;  %1761 = vst [vmem:[%s2889_s27 + $0x38] sm:$0xff] %v1760_v13  ;;  %v1764_v15 = vld [vmem:[%s2893_s12 + $0x48] sm:$0xff]  ;;  %v1766_v16 = vld [vmem:[%s2893_s12 + $0x50] sm:$0xff]  ;;  %s1811_s17 = smul.u32 248, %s3917_s29  ;;  %s3898_s23 = smov %s3917_s29 }
 0x2f2   : >> { %1763 = vst [vmem:[%s2889_s27 + $0x40] sm:$0xff] %v1762_v14  ;;  %v1768_v17 = vld [vmem:[%s2893_s12 + $0x58] sm:$0xff]  ;;  %1765 = vst [vmem:[%s2889_s27 + $0x48] sm:$0xff] %v1764_v15  ;;  %v1770_v18 = vld [vmem:[%s2893_s12 + $0x60] sm:$0xff] }
 0x2f3   : >> { %1767 = vst [vmem:[%s2889_s27 + $0x50] sm:$0xff] %v1766_v16  ;;  %1769 = vst [vmem:[%s2889_s27 + $0x58] sm:$0xff] %v1768_v17  ;;  %v1772_v19 = vld [vmem:[%s2893_s12 + $0x68] sm:$0xff]  ;;  %v1774_v20 = vld [vmem:[%s2893_s12 + $0x70] sm:$0xff]  ;;  %s1813_s22 = scalar_lea.vmem %s3153_s14, %s1811_s17 [#allocation4]   ;;  %s1814_s26 = scalar_lea.vmem %s3749_s20, %s1811_s17  }
 0x2f4   : >> { %1771 = vst [vmem:[%s2889_s27 + $0x60] sm:$0xff] %v1770_v18  ;;  %1773 = vst [vmem:[%s2889_s27 + $0x68] sm:$0xff] %v1772_v19  ;;  %v1776_v21 = vld [vmem:[%s2893_s12 + $0x78] sm:$0xff]  ;;  %v1778_v22 = vld [vmem:[%s2893_s12 + $0x80] sm:$0xff] }
 0x2f5   : >> { %1775 = vst [vmem:[%s2889_s27 + $0x70] sm:$0xff] %v1774_v20  ;;  %v1780_v23 = vld [vmem:[%s2893_s12 + $0x88] sm:$0xff]  ;;  %1777 = vst [vmem:[%s2889_s27 + $0x78] sm:$0xff] %v1776_v21  ;;  %v1782_v24 = vld [vmem:[%s2893_s12 + $0x90] sm:$0xff] }
 0x2f6   : >> { %1779 = vst [vmem:[%s2889_s27 + $0x80] sm:$0xff] %v1778_v22  ;;  %1781 = vst [vmem:[%s2889_s27 + $0x88] sm:$0xff] %v1780_v23  ;;  %v1784_v25 = vld [vmem:[%s2893_s12 + $0x98] sm:$0xff]  ;;  %v1786_v26 = vld [vmem:[%s2893_s12 + $0xa0] sm:$0xff] }
 0x2f7   : >> { %1783 = vst [vmem:[%s2889_s27 + $0x90] sm:$0xff] %v1782_v24  ;;  %1785 = vst [vmem:[%s2889_s27 + $0x98] sm:$0xff] %v1784_v25  ;;  %v1788_v27 = vld [vmem:[%s2893_s12 + $0xa8] sm:$0xff]  ;;  %v1790_v28 = vld [vmem:[%s2893_s12 + $0xb0] sm:$0xff]  ;;  %1742 = sbr.rel (!%p1739_p0) target bundleno = 749 (0x2ed), region = 318 }
 0x2f8   : >> { %1787 = vst [vmem:[%s2889_s27 + $0xa0] sm:$0xff] %v1786_v26  ;;  %v1792_v29 = vld [vmem:[%s2893_s12 + $0xb8] sm:$0xff]  ;;  %1789 = vst [vmem:[%s2889_s27 + $0xa8] sm:$0xff] %v1788_v27  ;;  %v1794_v30 = vld [vmem:[%s2893_s12 + $0xc0] sm:$0xff] }
 0x2f9   : >> { %1791 = vst [vmem:[%s2889_s27 + $0xb0] sm:$0xff] %v1790_v28  ;;  %1793 = vst [vmem:[%s2889_s27 + $0xb8] sm:$0xff] %v1792_v29  ;;  %v1796_v31 = vld [vmem:[%s2893_s12 + $0xc8] sm:$0xff]  ;;  %v1798_v32 = vld [vmem:[%s2893_s12 + $0xd0] sm:$0xff] }
 0x2fa   : >> { %1795 = vst [vmem:[%s2889_s27 + $0xc0] sm:$0xff] %v1794_v30  ;;  %1797 = vst [vmem:[%s2889_s27 + $0xc8] sm:$0xff] %v1796_v31  ;;  %v1800_v33 = vld [vmem:[%s2893_s12 + $0xd8] sm:$0xff]  ;;  %v1802_v34 = vld [vmem:[%s2893_s12 + $0xe0] sm:$0xff] }
 0x2fb   : >> { %1799 = vst [vmem:[%s2889_s27 + $0xd0] sm:$0xff] %v1798_v32  ;;  %v1804_v35 = vld [vmem:[%s2893_s12 + $0xe8] sm:$0xff]  ;;  %1801 = vst [vmem:[%s2889_s27 + $0xd8] sm:$0xff] %v1800_v33  ;;  %v1806_v36 = vld [vmem:[%s2893_s12 + $0xf0] sm:$0xff]  ;;  %s3897_s12 = smov %s1813_s22 }
 0x2fc   : >> { %1803 = vst [vmem:[%s2889_s27 + $0xe0] sm:$0xff] %v1802_v34  ;;  %1805 = vst [vmem:[%s2889_s27 + $0xe8] sm:$0xff] %v1804_v35 }
 0x2fd   : >> { %1807 = vst [vmem:[%s2889_s27 + $0xf0] sm:$0xff] %v1806_v36  ;;  %s3896_s27 = smov %s1814_s26 }
 0x2fe PF: > { %2701 = sdivrem.u32 %s3915_s18, 31 }
 0x2ff   : > { %s2189_s30 = smul.u32 248, %s3755_s9 }
 0x301   : > { %s1819_s0 = scalar_lea.vmem %s3153_s14, %s2189_s30 [#allocation4]   ;;  %s1821_s15 = scalar_lea.vmem %s3749_s20, %s2189_s30  }
 0x307   : > { %s2702_s19 = spop.drf %2701 }
 0x308   : > { %p2191_p1 = scmp.le.s32.totalorder %s2702_s19, 0 }
 0x309   : > { %s2903_s11 = smov (!%p2191_p1), %s1821_s15   ;;  %s2907_s24 = smov (!%p2191_p1), %s1819_s0  }
 0x30a   : > { %2046 = sbr.rel (%p2191_p1) target bundleno = 795 (0x31b), region = 323  ;;  %s2911_s10 = smov (!%p2191_p1), 0  }
 0x30b   : > { %s2915_s1 = smov (!%p2191_p1), 0  }
 0x311 LB: >> { %v1831_v37 = vld [vmem:[%s2909_s24] sm:$0xff]  ;;  %s1833_s13 = sadd.s32 1, %s2913_s10  ;;  %s1825_s1 = sadd.s32 1, %s2917_s1   ;;  %s2917_s1 = sphi %s2915_s1, %s1825_s1   ;;  %s2913_s10 = sphi %s2911_s10, %s2912_s10   ;;  %s2909_s24 = sphi %s2907_s24, %s1838_s24   ;;  %s2905_s11 = sphi %s2903_s11, %s1839_s11  }
 0x312   : >> { %1832 = vst [vmem:[%s2905_s11] sm:$0xff] %v1831_v37  ;;  %p1834_p2 = scmp.ge.s32.totalorder %s1833_s13, %s2702_s19  ;;  %p1824_p3 = scmp.ge.s32.totalorder %s1825_s1, %s2702_s19 }
 0x314   : >> { %s3919_s13 = smov (%p1834_p2, %s1833_s13), 0  ;;  %1827 = sbr.rel (!%p1824_p3) target bundleno = 785 (0x311), region = 329 }
 0x315   : >> { %s2192_s14 = sshll.u32 %s3919_s13, 3  ;;  %s2912_s10 = smov %s3919_s13  }
 0x316   : >> { %s1838_s24 = scalar_lea.vmem %s1819_s0, %s2192_s14 [#allocation4]   ;;  %s1839_s11 = scalar_lea.vmem %s1821_s15, %s2192_s14  }
 0x31b PF: > { %p15_p5 = scmp.ge.s32.totalorder %s2977_s28, 5   ;;  %s3899_s24 = smov %s2817_s25 }
 0x31c   : > { %s3900_s25 = smov %s2985_s8  ;;  %s3901_s26 = smov %s2977_s28 }
 0x31d   :  { %17 = sbr.rel (!%p15_p5) target bundleno = 5 (0x5), region = 340 }

</bundles_post_ra>
